<compile_context>
chip_gen: v7x
topology: tpu7x:2x2x1
jax: 0.10.0
libtpu: 0.0.40
codegen_flags: <defaults>
</compile_context>

<pallas_src>
import functools

import jax
import jax.numpy as jnp
from jax.experimental import pallas as pl
from jax.experimental.pallas import tpu as pltpu

_EPS = 1e-5     # nn.BatchNorm2d default eps
_KSIZE = 3      # module default ksize
# Operand dtype for the wide-channel MXU path (bf16 on v6e/v7x for ~2x MXU + half the
# weight DMA bytes; accumulation stays f32).  Kept f32 here to match PyTorch numerics.
_MM_DTYPE = jnp.float32


def _channel_mix(w_t, v):
    """(Cout, Cin) @ (Cin, L) -> (Cout, L) in f32.

    Wide channels: one MXU dot.  Tiny channels (like the C=4 demo): a K=4 MXU
    contraction would waste the array, so the mix is done as Cin VPU outer-product
    accumulations instead (fix tiny-C utilisation via compute choice, not by padding
    zeros into the MXU).
    """
    cout, cin = w_t.shape
    if cin >= 16:
        return jnp.dot(w_t.astype(_MM_DTYPE), v.astype(_MM_DTYPE),
                       preferred_element_type=jnp.float32)
    acc = w_t[:, 0:1] * v[0:1, :]
    for ci in range(1, cin):
        acc = acc + w_t[:, ci:ci + 1] * v[ci:ci + 1, :]
    return acc


def _convblock_kernel(x_ref, w1t_ref, w2t_ref, w3t_ref, vecs_ref, rowm_ref,
                      colm_ref, out_ref, *, W):
    """One (image, row-tile) pair per grid step.  Layout: channels on sublanes,
    flattened spatial on lanes.

    x_ref:   (1, 1, C, (TH+2)*W) raw input rows [r0-1, r0+TH+1) (1-row halo each
                                 side; rows outside the image are physical zeros)
    w1t/w3t: (C, C)              BN-folded 1x1 conv weights, (Cout, Cin)
    w2t:     (9, C, C)           3x3 conv weights per tap, (Cout, Cin)
    vecs:    (C, 5)              columns: b1_fold, bn2_scale, bn2_shift, b2, b3_fold
    rowm:    (1, 1, (TH+2)*W)    zeros on the out-of-image halo rows of this tile
    colm:    (2, TH*W)           [0]: zeros at x==0,  [1]: zeros at x==W-1
    out_ref: (1, C, TH*W)        output rows [r0, r0+TH)
    """
    C, CW = x_ref.shape[2], x_ref.shape[3]
    THW = out_ref.shape[2]
    f32 = jnp.float32

    ctx = x_ref[...].reshape(C, CW)            # raw input (residual + layer-1 input)
    vecs = vecs_ref[...]
    b1, s2, h2 = vecs[:, 0:1], vecs[:, 1:2], vecs[:, 2:3]
    b2, b3 = vecs[:, 3:4], vecs[:, 4:5]

    # ---- layer 1 (BN folded): 1x1 conv + ReLU on the tile and its halo rows ----
    t1 = jnp.maximum(_channel_mix(w1t_ref[...], ctx) + b1, 0.0)

    # BN2 affine; the row mask forces the 3x3 conv's zero-padding rows (outside the
    # image) to exactly 0 -- padded taps must see 0, not BN2(ReLU(b1)).
    u = rowm_ref[...].reshape(1, CW) * (s2 * t1 + h2)

    # ---- layer 2: 3x3 SAME conv as 9 accumulating channel-mixes over statically
    # shifted windows of the flat activation (no materialized im2col buffer). ----
    z = jnp.concatenate([jnp.zeros((C, 1), f32), u, jnp.zeros((C, 1), f32)], axis=1)
    mask_l = colm_ref[0:1, :]                  # zero output column x == 0
    mask_r = colm_ref[1:2, :]                  # zero output column x == W-1
    w2all = w2t_ref[...]
    acc = jnp.zeros((C, THW), f32)
    for ky in range(_KSIZE):
        for kx in range(_KSIZE):
            d = (ky - 1) * W + (kx - 1)
            tap = z[:, W + 1 + d:W + 1 + d + THW]
            if kx == 0:
                tap = tap * mask_l
            elif kx == 2:
                tap = tap * mask_r
            acc = acc + _channel_mix(w2all[_KSIZE * ky + kx], tap)
    t2 = jnp.maximum(acc + b2, 0.0)

    # ---- layer 3 (BN folded): 1x1 conv + ReLU ----
    t3 = jnp.maximum(_channel_mix(w3t_ref[...], t2) + b3, 0.0)

    # ---- residual add with the untouched input rows; 128-lane-aligned store ----
    out_ref[...] = (ctx[:, W:W + THW] + t3).reshape(1, C, THW)


def _fold_params(params, C):
    """Fold eval-mode BN of layers 1 & 3 into the 1x1 convs; re-lay-out weights."""
    scale = params["gamma"] * jax.lax.rsqrt(params["var"] + _EPS)    # (3, C)
    shift = params["beta"] - params["mean"] * scale                  # (3, C)

    # 1x1 convs (no padding): exact fold into weight + bias; store as (Cout, Cin).
    w1t = (scale[0][:, None] * params["w1"]).T
    b1e = params["b1"].reshape(-1) + shift[0] @ params["w1"]
    w3t = (scale[2][:, None] * params["w3"]).T
    b3e = params["b3"].reshape(-1) + shift[2] @ params["w3"]

    # 3x3 conv (SAME zero padding): BN2 is applied in-kernel before padding (exact
    # at the borders), so the weight only needs a per-tap (Cout, Cin) layout.
    w2t = jnp.transpose(params["w2"], (0, 1, 3, 2)).reshape(_KSIZE * _KSIZE, C, C)

    vecs = jnp.stack(
        [b1e, scale[1], shift[1], params["b2"].reshape(-1), b3e], axis=1)  # (C, 5)
    return (w1t.astype(jnp.float32), w2t.astype(jnp.float32),
            w3t.astype(jnp.float32), vecs.astype(jnp.float32))


def _pick_row_tile(H, W):
    """Row-tile height: divides H, keeps TH*W a multiple of 128 (lane-aligned output
    blocks), and prefers >=512 output lanes per tile to bound per-step overhead."""
    cands = [t for t in range(1, H + 1) if H % t == 0 and (t * W) % 128 == 0]
    if not cands:
        return H
    big = [t for t in cands if t * W >= 512]
    return big[0] if big else cands[0]


def conv_block(x_nchw, params):
    """NCHW in / NCHW out.  No transposes, no channel padding: the kernel consumes
    the NCHW data as (C, rows*W) after free reshapes."""
    N, C, H, W = x_nchw.shape
    TH = _pick_row_tile(H, W)
    NT = H // TH
    THW, CW = TH * W, (TH + 2) * W

    xf = x_nchw.astype(jnp.float32)
    # One zero row of SAME padding above/below, then flatten spatial (contiguous ->
    # free reshape for NCHW).
    xp = jnp.pad(xf, ((0, 0), (0, 0), (1, 1), (0, 0))).reshape(N, C, (H + 2) * W)
    # Overlapping row-tile contexts (tile i = rows [i*TH-1, i*TH+TH+1)), gathered in
    # the wrapper so every grid step is a plain non-overlapping BlockSpec fetch.
    # Only the 2 halo rows per tile are duplicated (~(TH+2)/TH HBM overhead).
    xt = jnp.stack([xp[:, :, i * THW:i * THW + CW] for i in range(NT)], axis=1)

    w1t, w2t, w3t, vecs = _fold_params(params, C)

    # Row mask: zero on the out-of-image halo rows of the first/last tile.
    rowmask = jnp.ones((NT, TH + 2, W), jnp.float32)
    rowmask = rowmask.at[0, 0, :].set(0.0)
    rowmask = rowmask.at[NT - 1, TH + 1, :].set(0.0)
    rowmask = rowmask.reshape(NT, 1, CW)
    # Column masks for the 3x3 conv's x-direction zero padding.
    colmask = jnp.ones((2, TH, W), jnp.float32)
    colmask = colmask.at[0, :, 0].set(0.0)
    colmask = colmask.at[1, :, W - 1].set(0.0)
    colmask = colmask.reshape(2, THW)

    # Per-step VMEM footprint: double-buffered x/out/rowmask blocks, single-buffered
    # constants, plus headroom for in-kernel temporaries.
    block_bytes = 4 * (2 * C * CW + 2 * C * THW + 2 * CW + 2 * THW
                       + (2 + _KSIZE * _KSIZE) * C * C + 5 * C
                       + 8 * C * (CW + 2))
    vmem_limit = int(min(64 * 2 ** 20, max(4 * 2 ** 20, 8 * block_bytes)))

    kernel = functools.partial(_convblock_kernel, W=W)
    const = dict(pipeline_mode=pl.Buffered(1))   # fetched once, single-buffered
    out = pl.pallas_call(
        kernel,
        out_shape=jax.ShapeDtypeStruct((N, C, H * W), jnp.float32),
        grid=(N, NT),
        in_specs=[
            pl.BlockSpec((1, 1, C, CW), lambda n, i: (n, i, 0, 0)),
            pl.BlockSpec((C, C), lambda n, i: (0, 0), **const),
            pl.BlockSpec((_KSIZE * _KSIZE, C, C), lambda n, i: (0, 0, 0), **const),
            pl.BlockSpec((C, C), lambda n, i: (0, 0), **const),
            pl.BlockSpec((C, 5), lambda n, i: (0, 0), **const),
            pl.BlockSpec((1, 1, CW), lambda n, i: (i, 0, 0)),
            pl.BlockSpec((2, THW), lambda n, i: (0, 0), **const),
        ],
        out_specs=pl.BlockSpec((1, C, THW), lambda n, i: (n, 0, i)),
        compiler_params=pltpu.CompilerParams(
            dimension_semantics=("parallel", "parallel"),
            vmem_limit_bytes=vmem_limit,
        ),
    )(xt, w1t, w2t, w3t, vecs, rowmask, colmask)

    return out.reshape(N, C, H, W)


def _reference(x_nchw, params):
    """Pure-JAX reference with UN-folded BN (same math as the PyTorch module, eval)."""
    x = jnp.transpose(x_nchw, (0, 2, 3, 1)).astype(jnp.float32)

    def bn(a, i):
        scale = params["gamma"][i] * jax.lax.rsqrt(params["var"][i] + _EPS)
        return a * scale + (params["beta"][i] - params["mean"][i] * scale)

    t = bn(x, 0)
    t = jax.nn.relu(jnp.einsum("nhwc,cd->nhwd", t, params["w1"]) + params["b1"])
    t = bn(t, 1)
    t = jax.lax.conv_general_dilated(
        t, params["w2"], window_strides=(1, 1), padding="SAME",
        dimension_numbers=("NHWC", "HWIO", "NHWC")) + params["b2"]
    t = jax.nn.relu(t)
    t = bn(t, 2)
    t = jax.nn.relu(jnp.einsum("nhwc,cd->nhwd", t, params["w3"]) + params["b3"])
    return jnp.transpose(x + t, (0, 3, 1, 2))


if __name__ == "__main__":
    N, C, H, W = 2, 4, 16, 16        # indim == outdim == 4, ksize=3, stride=1
    keys = jax.random.split(jax.random.PRNGKey(0), 12)
    params = {
        "gamma": jax.random.uniform(keys[0], (3, C), jnp.float32, 0.5, 1.5),
        "beta":  0.1 * jax.random.normal(keys[1], (3, C), jnp.float32),
        "mean":  0.1 * jax.random.normal(keys[2], (3, C), jnp.float32),
        "var":   jax.random.uniform(keys[3], (3, C), jnp.float32, 0.5, 1.5),
        "w1":    0.3 * jax.random.normal(keys[4], (C, C), jnp.float32),
        "b1":    0.1 * jax.random.normal(keys[5], (1, C), jnp.float32),
        "w2":    0.2 * jax.random.normal(keys[6], (_KSIZE, _KSIZE, C, C), jnp.float32),
        "b2":    0.1 * jax.random.normal(keys[7], (1, C), jnp.float32),
        "w3":    0.3 * jax.random.normal(keys[8], (C, C), jnp.float32),
        "b3":    0.1 * jax.random.normal(keys[9], (1, C), jnp.float32),
    }
    x = jax.random.normal(keys[10], (N, C, H, W), jnp.float32)

    out = jax.block_until_ready(jax.jit(conv_block)(x, params))
    ref = jax.block_until_ready(_reference(x, params))

    assert out.shape == x.shape and out.dtype == jnp.float32
    err = float(jnp.max(jnp.abs(out - ref)))
    assert jnp.allclose(out, ref, atol=1e-4, rtol=1e-4), err
    print("KERNEL_OK")
</pallas_src>

<mosaic_0001>
module attributes {stable_mosaic.version = 11 : i64} {
  func.func @_convblock_kernel(%arg0: i32, %arg1: i32, %arg2: memref<1x1x4x160xf32, #tpu.memory_space<vmem>>, %arg3: memref<4x4xf32, #tpu.memory_space<vmem>>, %arg4: memref<9x4x4xf32, #tpu.memory_space<vmem>>, %arg5: memref<4x4xf32, #tpu.memory_space<vmem>>, %arg6: memref<4x5xf32, #tpu.memory_space<vmem>>, %arg7: memref<1x1x160xf32, #tpu.memory_space<vmem>>, %arg8: memref<2x128xf32, #tpu.memory_space<vmem>>, %arg9: memref<1x4x128xf32, #tpu.memory_space<vmem>>) attributes {dimension_semantics = [#tpu.dimension_semantics<parallel>, #tpu.dimension_semantics<parallel>], iteration_bounds = array<i64: 2, 2>, scalar_prefetch = 0 : i64, scratch_operands = 0 : i64, tpu.core_type = #tpu.core_type<tc>, window_params = [{transform_indices = @transform_0, window_bounds = array<i64: 1, 1, 4, 160>}, {pipeline_mode = #tpu.pipeline_mode<synchronous>, transform_indices = @transform_1, window_bounds = array<i64: 4, 4>}, {pipeline_mode = #tpu.pipeline_mode<synchronous>, transform_indices = @transform_2, window_bounds = array<i64: 9, 4, 4>}, {pipeline_mode = #tpu.pipeline_mode<synchronous>, transform_indices = @transform_3, window_bounds = array<i64: 4, 4>}, {pipeline_mode = #tpu.pipeline_mode<synchronous>, transform_indices = @transform_4, window_bounds = array<i64: 4, 5>}, {transform_indices = @transform_5, window_bounds = array<i64: 1, 1, 160>}, {pipeline_mode = #tpu.pipeline_mode<synchronous>, transform_indices = @transform_6, window_bounds = array<i64: 2, 128>}, {transform_indices = @transform_7, window_bounds = array<i64: 1, 4, 128>}]} {
    %c0 = arith.constant 0 : index
    %c0_0 = arith.constant 0 : index
    %c0_1 = arith.constant 0 : index
    %c0_2 = arith.constant 0 : index
    %0 = vector.load %arg2[%c0, %c0_0, %c0_1, %c0_2] : memref<1x1x4x160xf32, #tpu.memory_space<vmem>>, vector<1x1x4x160xf32>
    %1 = vector.shape_cast %0 : vector<1x1x4x160xf32> to vector<4x160xf32>
    %c0_3 = arith.constant 0 : index
    %c0_4 = arith.constant 0 : index
    %2 = vector.load %arg6[%c0_3, %c0_4] : memref<4x5xf32, #tpu.memory_space<vmem>>, vector<4x5xf32>
    %3 = vector.extract_strided_slice %2 {offsets = [0, 0], sizes = [4, 1], strides = [1, 1]} : vector<4x5xf32> to vector<4x1xf32>
    %4 = vector.extract_strided_slice %2 {offsets = [0, 1], sizes = [4, 1], strides = [1, 1]} : vector<4x5xf32> to vector<4x1xf32>
    %5 = vector.extract_strided_slice %2 {offsets = [0, 2], sizes = [4, 1], strides = [1, 1]} : vector<4x5xf32> to vector<4x1xf32>
    %6 = vector.extract_strided_slice %2 {offsets = [0, 3], sizes = [4, 1], strides = [1, 1]} : vector<4x5xf32> to vector<4x1xf32>
    %7 = vector.extract_strided_slice %2 {offsets = [0, 4], sizes = [4, 1], strides = [1, 1]} : vector<4x5xf32> to vector<4x1xf32>
    %c0_5 = arith.constant 0 : index
    %c0_6 = arith.constant 0 : index
    %8 = vector.load %arg3[%c0_5, %c0_6] : memref<4x4xf32, #tpu.memory_space<vmem>>, vector<4x4xf32>
    %9 = vector.extract_strided_slice %8 {offsets = [0, 0], sizes = [4, 1], strides = [1, 1]} : vector<4x4xf32> to vector<4x1xf32>
    %10 = vector.extract_strided_slice %1 {offsets = [0, 0], sizes = [1, 160], strides = [1, 1]} : vector<4x160xf32> to vector<1x160xf32>
    %11 = vector.broadcast %9 : vector<4x1xf32> to vector<4x160xf32>
    %12 = vector.broadcast %10 : vector<1x160xf32> to vector<4x160xf32>
    %13 = arith.mulf %11, %12 : vector<4x160xf32>
    %14 = vector.extract_strided_slice %8 {offsets = [0, 1], sizes = [4, 1], strides = [1, 1]} : vector<4x4xf32> to vector<4x1xf32>
    %15 = vector.extract_strided_slice %1 {offsets = [1, 0], sizes = [1, 160], strides = [1, 1]} : vector<4x160xf32> to vector<1x160xf32>
    %16 = vector.broadcast %14 : vector<4x1xf32> to vector<4x160xf32>
    %17 = vector.broadcast %15 : vector<1x160xf32> to vector<4x160xf32>
    %18 = arith.mulf %16, %17 : vector<4x160xf32>
    %19 = arith.addf %13, %18 : vector<4x160xf32>
    %20 = vector.extract_strided_slice %8 {offsets = [0, 2], sizes = [4, 1], strides = [1, 1]} : vector<4x4xf32> to vector<4x1xf32>
    %21 = vector.extract_strided_slice %1 {offsets = [2, 0], sizes = [1, 160], strides = [1, 1]} : vector<4x160xf32> to vector<1x160xf32>
    %22 = vector.broadcast %20 : vector<4x1xf32> to vector<4x160xf32>
    %23 = vector.broadcast %21 : vector<1x160xf32> to vector<4x160xf32>
    %24 = arith.mulf %22, %23 : vector<4x160xf32>
    %25 = arith.addf %19, %24 : vector<4x160xf32>
    %26 = vector.extract_strided_slice %8 {offsets = [0, 3], sizes = [4, 1], strides = [1, 1]} : vector<4x4xf32> to vector<4x1xf32>
    %27 = vector.extract_strided_slice %1 {offsets = [3, 0], sizes = [1, 160], strides = [1, 1]} : vector<4x160xf32> to vector<1x160xf32>
    %28 = vector.broadcast %26 : vector<4x1xf32> to vector<4x160xf32>
    %29 = vector.broadcast %27 : vector<1x160xf32> to vector<4x160xf32>
    %30 = arith.mulf %28, %29 : vector<4x160xf32>
    %31 = arith.addf %25, %30 : vector<4x160xf32>
    %32 = vector.broadcast %3 : vector<4x1xf32> to vector<4x160xf32>
    %33 = arith.addf %31, %32 : vector<4x160xf32>
    %cst = arith.constant 0.000000e+00 : f32
    %34 = vector.broadcast %cst : f32 to vector<4x160xf32>
    %35 = arith.maximumf %33, %34 : vector<4x160xf32>
    %c0_7 = arith.constant 0 : index
    %c0_8 = arith.constant 0 : index
    %c0_9 = arith.constant 0 : index
    %36 = vector.load %arg7[%c0_7, %c0_8, %c0_9] : memref<1x1x160xf32, #tpu.memory_space<vmem>>, vector<1x1x160xf32>
    %37 = vector.shape_cast %36 : vector<1x1x160xf32> to vector<1x160xf32>
    %38 = vector.broadcast %4 : vector<4x1xf32> to vector<4x160xf32>
    %39 = arith.mulf %38, %35 : vector<4x160xf32>
    %40 = vector.broadcast %5 : vector<4x1xf32> to vector<4x160xf32>
    %41 = arith.addf %39, %40 : vector<4x160xf32>
    %42 = vector.broadcast %37 : vector<1x160xf32> to vector<4x160xf32>
    %43 = arith.mulf %42, %41 : vector<4x160xf32>
    %cst_10 = arith.constant 0.000000e+00 : f32
    %44 = vector.broadcast %cst_10 : f32 to vector<4x1xf32>
    %cst_11 = arith.constant 0.000000e+00 : f32
    %45 = vector.broadcast %cst_11 : f32 to vector<4x1xf32>
    %46 = tpu.concatenate %44, %43, %45 in 1 : vector<4x1xf32>, vector<4x160xf32>, vector<4x1xf32> -> vector<4x162xf32>
    %c0_12 = arith.constant 0 : index
    %c0_13 = arith.constant 0 : index
    %47 = vector.load %arg8[%c0_12, %c0_13] : memref<2x128xf32, #tpu.memory_space<vmem>>, vector<1x128xf32>
    %c1 = arith.constant 1 : index
    %c0_14 = arith.constant 0 : index
    %48 = vector.load %arg8[%c1, %c0_14] : memref<2x128xf32, #tpu.memory_space<vmem>>, vector<1x128xf32>
    %c0_15 = arith.constant 0 : index
    %c0_16 = arith.constant 0 : index
    %c0_17 = arith.constant 0 : index
    %49 = vector.load %arg4[%c0_15, %c0_16, %c0_17] : memref<9x4x4xf32, #tpu.memory_space<vmem>>, vector<9x4x4xf32>
    %cst_18 = arith.constant 0.000000e+00 : f32
    %50 = vector.broadcast %cst_18 : f32 to vector<4x128xf32>
    %51 = vector.extract_strided_slice %46 {offsets = [0, 0], sizes = [4, 128], strides = [1, 1]} : vector<4x162xf32> to vector<4x128xf32>
    %52 = vector.broadcast %47 : vector<1x128xf32> to vector<4x128xf32>
    %53 = arith.mulf %51, %52 : vector<4x128xf32>
    %54 = vector.extract_strided_slice %49 {offsets = [0, 0, 0], sizes = [1, 4, 4], strides = [1, 1, 1]} : vector<9x4x4xf32> to vector<1x4x4xf32>
    %55 = vector.shape_cast %54 : vector<1x4x4xf32> to vector<4x4xf32>
    %56 = vector.extract_strided_slice %55 {offsets = [0, 0], sizes = [4, 1], strides = [1, 1]} : vector<4x4xf32> to vector<4x1xf32>
    %57 = vector.extract_strided_slice %53 {offsets = [0, 0], sizes = [1, 128], strides = [1, 1]} : vector<4x128xf32> to vector<1x128xf32>
    %58 = vector.broadcast %56 : vector<4x1xf32> to vector<4x128xf32>
    %59 = vector.broadcast %57 : vector<1x128xf32> to vector<4x128xf32>
    %60 = arith.mulf %58, %59 : vector<4x128xf32>
    %61 = vector.extract_strided_slice %55 {offsets = [0, 1], sizes = [4, 1], strides = [1, 1]} : vector<4x4xf32> to vector<4x1xf32>
    %62 = vector.extract_strided_slice %53 {offsets = [1, 0], sizes = [1, 128], strides = [1, 1]} : vector<4x128xf32> to vector<1x128xf32>
    %63 = vector.broadcast %61 : vector<4x1xf32> to vector<4x128xf32>
    %64 = vector.broadcast %62 : vector<1x128xf32> to vector<4x128xf32>
    %65 = arith.mulf %63, %64 : vector<4x128xf32>
    %66 = arith.addf %60, %65 : vector<4x128xf32>
    %67 = vector.extract_strided_slice %55 {offsets = [0, 2], sizes = [4, 1], strides = [1, 1]} : vector<4x4xf32> to vector<4x1xf32>
    %68 = vector.extract_strided_slice %53 {offsets = [2, 0], sizes = [1, 128], strides = [1, 1]} : vector<4x128xf32> to vector<1x128xf32>
    %69 = vector.broadcast %67 : vector<4x1xf32> to vector<4x128xf32>
    %70 = vector.broadcast %68 : vector<1x128xf32> to vector<4x128xf32>
    %71 = arith.mulf %69, %70 : vector<4x128xf32>
    %72 = arith.addf %66, %71 : vector<4x128xf32>
    %73 = vector.extract_strided_slice %55 {offsets = [0, 3], sizes = [4, 1], strides = [1, 1]} : vector<4x4xf32> to vector<4x1xf32>
    %74 = vector.extract_strided_slice %53 {offsets = [3, 0], sizes = [1, 128], strides = [1, 1]} : vector<4x128xf32> to vector<1x128xf32>
    %75 = vector.broadcast %73 : vector<4x1xf32> to vector<4x128xf32>
    %76 = vector.broadcast %74 : vector<1x128xf32> to vector<4x128xf32>
    %77 = arith.mulf %75, %76 : vector<4x128xf32>
    %78 = arith.addf %72, %77 : vector<4x128xf32>
    %79 = arith.addf %50, %78 : vector<4x128xf32>
    %80 = vector.extract_strided_slice %46 {offsets = [0, 1], sizes = [4, 128], strides = [1, 1]} : vector<4x162xf32> to vector<4x128xf32>
    %81 = vector.extract_strided_slice %49 {offsets = [1, 0, 0], sizes = [1, 4, 4], strides = [1, 1, 1]} : vector<9x4x4xf32> to vector<1x4x4xf32>
    %82 = vector.shape_cast %81 : vector<1x4x4xf32> to vector<4x4xf32>
    %83 = vector.extract_strided_slice %82 {offsets = [0, 0], sizes = [4, 1], strides = [1, 1]} : vector<4x4xf32> to vector<4x1xf32>
    %84 = vector.extract_strided_slice %80 {offsets = [0, 0], sizes = [1, 128], strides = [1, 1]} : vector<4x128xf32> to vector<1x128xf32>
    %85 = vector.broadcast %83 : vector<4x1xf32> to vector<4x128xf32>
    %86 = vector.broadcast %84 : vector<1x128xf32> to vector<4x128xf32>
    %87 = arith.mulf %85, %86 : vector<4x128xf32>
    %88 = vector.extract_strided_slice %82 {offsets = [0, 1], sizes = [4, 1], strides = [1, 1]} : vector<4x4xf32> to vector<4x1xf32>
    %89 = vector.extract_strided_slice %80 {offsets = [1, 0], sizes = [1, 128], strides = [1, 1]} : vector<4x128xf32> to vector<1x128xf32>
    %90 = vector.broadcast %88 : vector<4x1xf32> to vector<4x128xf32>
    %91 = vector.broadcast %89 : vector<1x128xf32> to vector<4x128xf32>
    %92 = arith.mulf %90, %91 : vector<4x128xf32>
    %93 = arith.addf %87, %92 : vector<4x128xf32>
    %94 = vector.extract_strided_slice %82 {offsets = [0, 2], sizes = [4, 1], strides = [1, 1]} : vector<4x4xf32> to vector<4x1xf32>
    %95 = vector.extract_strided_slice %80 {offsets = [2, 0], sizes = [1, 128], strides = [1, 1]} : vector<4x128xf32> to vector<1x128xf32>
    %96 = vector.broadcast %94 : vector<4x1xf32> to vector<4x128xf32>
    %97 = vector.broadcast %95 : vector<1x128xf32> to vector<4x128xf32>
    %98 = arith.mulf %96, %97 : vector<4x128xf32>
    %99 = arith.addf %93, %98 : vector<4x128xf32>
    %100 = vector.extract_strided_slice %82 {offsets = [0, 3], sizes = [4, 1], strides = [1, 1]} : vector<4x4xf32> to vector<4x1xf32>
    %101 = vector.extract_strided_slice %80 {offsets = [3, 0], sizes = [1, 128], strides = [1, 1]} : vector<4x128xf32> to vector<1x128xf32>
    %102 = vector.broadcast %100 : vector<4x1xf32> to vector<4x128xf32>
    %103 = vector.broadcast %101 : vector<1x128xf32> to vector<4x128xf32>
    %104 = arith.mulf %102, %103 : vector<4x128xf32>
    %105 = arith.addf %99, %104 : vector<4x128xf32>
    %106 = arith.addf %79, %105 : vector<4x128xf32>
    %107 = vector.extract_strided_slice %46 {offsets = [0, 2], sizes = [4, 128], strides = [1, 1]} : vector<4x162xf32> to vector<4x128xf32>
    %108 = vector.broadcast %48 : vector<1x128xf32> to vector<4x128xf32>
    %109 = arith.mulf %107, %108 : vector<4x128xf32>
    %110 = vector.extract_strided_slice %49 {offsets = [2, 0, 0], sizes = [1, 4, 4], strides = [1, 1, 1]} : vector<9x4x4xf32> to vector<1x4x4xf32>
    %111 = vector.shape_cast %110 : vector<1x4x4xf32> to vector<4x4xf32>
    %112 = vector.extract_strided_slice %111 {offsets = [0, 0], sizes = [4, 1], strides = [1, 1]} : vector<4x4xf32> to vector<4x1xf32>
    %113 = vector.extract_strided_slice %109 {offsets = [0, 0], sizes = [1, 128], strides = [1, 1]} : vector<4x128xf32> to vector<1x128xf32>
    %114 = vector.broadcast %112 : vector<4x1xf32> to vector<4x128xf32>
    %115 = vector.broadcast %113 : vector<1x128xf32> to vector<4x128xf32>
    %116 = arith.mulf %114, %115 : vector<4x128xf32>
    %117 = vector.extract_strided_slice %111 {offsets = [0, 1], sizes = [4, 1], strides = [1, 1]} : vector<4x4xf32> to vector<4x1xf32>
    %118 = vector.extract_strided_slice %109 {offsets = [1, 0], sizes = [1, 128], strides = [1, 1]} : vector<4x128xf32> to vector<1x128xf32>
    %119 = vector.broadcast %117 : vector<4x1xf32> to vector<4x128xf32>
    %120 = vector.broadcast %118 : vector<1x128xf32> to vector<4x128xf32>
    %121 = arith.mulf %119, %120 : vector<4x128xf32>
    %122 = arith.addf %116, %121 : vector<4x128xf32>
    %123 = vector.extract_strided_slice %111 {offsets = [0, 2], sizes = [4, 1], strides = [1, 1]} : vector<4x4xf32> to vector<4x1xf32>
    %124 = vector.extract_strided_slice %109 {offsets = [2, 0], sizes = [1, 128], strides = [1, 1]} : vector<4x128xf32> to vector<1x128xf32>
    %125 = vector.broadcast %123 : vector<4x1xf32> to vector<4x128xf32>
    %126 = vector.broadcast %124 : vector<1x128xf32> to vector<4x128xf32>
    %127 = arith.mulf %125, %126 : vector<4x128xf32>
    %128 = arith.addf %122, %127 : vector<4x128xf32>
    %129 = vector.extract_strided_slice %111 {offsets = [0, 3], sizes = [4, 1], strides = [1, 1]} : vector<4x4xf32> to vector<4x1xf32>
    %130 = vector.extract_strided_slice %109 {offsets = [3, 0], sizes = [1, 128], strides = [1, 1]} : vector<4x128xf32> to vector<1x128xf32>
    %131 = vector.broadcast %129 : vector<4x1xf32> to vector<4x128xf32>
    %132 = vector.broadcast %130 : vector<1x128xf32> to vector<4x128xf32>
    %133 = arith.mulf %131, %132 : vector<4x128xf32>
    %134 = arith.addf %128, %133 : vector<4x128xf32>
    %135 = arith.addf %106, %134 : vector<4x128xf32>
    %136 = vector.extract_strided_slice %46 {offsets = [0, 16], sizes = [4, 128], strides = [1, 1]} : vector<4x162xf32> to vector<4x128xf32>
    %137 = vector.broadcast %47 : vector<1x128xf32> to vector<4x128xf32>
    %138 = arith.mulf %136, %137 : vector<4x128xf32>
    %139 = vector.extract_strided_slice %49 {offsets = [3, 0, 0], sizes = [1, 4, 4], strides = [1, 1, 1]} : vector<9x4x4xf32> to vector<1x4x4xf32>
    %140 = vector.shape_cast %139 : vector<1x4x4xf32> to vector<4x4xf32>
    %141 = vector.extract_strided_slice %140 {offsets = [0, 0], sizes = [4, 1], strides = [1, 1]} : vector<4x4xf32> to vector<4x1xf32>
    %142 = vector.extract_strided_slice %138 {offsets = [0, 0], sizes = [1, 128], strides = [1, 1]} : vector<4x128xf32> to vector<1x128xf32>
    %143 = vector.broadcast %141 : vector<4x1xf32> to vector<4x128xf32>
    %144 = vector.broadcast %142 : vector<1x128xf32> to vector<4x128xf32>
    %145 = arith.mulf %143, %144 : vector<4x128xf32>
    %146 = vector.extract_strided_slice %140 {offsets = [0, 1], sizes = [4, 1], strides = [1, 1]} : vector<4x4xf32> to vector<4x1xf32>
    %147 = vector.extract_strided_slice %138 {offsets = [1, 0], sizes = [1, 128], strides = [1, 1]} : vector<4x128xf32> to vector<1x128xf32>
    %148 = vector.broadcast %146 : vector<4x1xf32> to vector<4x128xf32>
    %149 = vector.broadcast %147 : vector<1x128xf32> to vector<4x128xf32>
    %150 = arith.mulf %148, %149 : vector<4x128xf32>
    %151 = arith.addf %145, %150 : vector<4x128xf32>
    %152 = vector.extract_strided_slice %140 {offsets = [0, 2], sizes = [4, 1], strides = [1, 1]} : vector<4x4xf32> to vector<4x1xf32>
    %153 = vector.extract_strided_slice %138 {offsets = [2, 0], sizes = [1, 128], strides = [1, 1]} : vector<4x128xf32> to vector<1x128xf32>
    %154 = vector.broadcast %152 : vector<4x1xf32> to vector<4x128xf32>
    %155 = vector.broadcast %153 : vector<1x128xf32> to vector<4x128xf32>
    %156 = arith.mulf %154, %155 : vector<4x128xf32>
    %157 = arith.addf %151, %156 : vector<4x128xf32>
    %158 = vector.extract_strided_slice %140 {offsets = [0, 3], sizes = [4, 1], strides = [1, 1]} : vector<4x4xf32> to vector<4x1xf32>
    %159 = vector.extract_strided_slice %138 {offsets = [3, 0], sizes = [1, 128], strides = [1, 1]} : vector<4x128xf32> to vector<1x128xf32>
    %160 = vector.broadcast %158 : vector<4x1xf32> to vector<4x128xf32>
    %161 = vector.broadcast %159 : vector<1x128xf32> to vector<4x128xf32>
    %162 = arith.mulf %160, %161 : vector<4x128xf32>
    %163 = arith.addf %157, %162 : vector<4x128xf32>
    %164 = arith.addf %135, %163 : vector<4x128xf32>
    %165 = vector.extract_strided_slice %46 {offsets = [0, 17], sizes = [4, 128], strides = [1, 1]} : vector<4x162xf32> to vector<4x128xf32>
    %166 = vector.extract_strided_slice %49 {offsets = [4, 0, 0], sizes = [1, 4, 4], strides = [1, 1, 1]} : vector<9x4x4xf32> to vector<1x4x4xf32>
    %167 = vector.shape_cast %166 : vector<1x4x4xf32> to vector<4x4xf32>
    %168 = vector.extract_strided_slice %167 {offsets = [0, 0], sizes = [4, 1], strides = [1, 1]} : vector<4x4xf32> to vector<4x1xf32>
    %169 = vector.extract_strided_slice %165 {offsets = [0, 0], sizes = [1, 128], strides = [1, 1]} : vector<4x128xf32> to vector<1x128xf32>
    %170 = vector.broadcast %168 : vector<4x1xf32> to vector<4x128xf32>
    %171 = vector.broadcast %169 : vector<1x128xf32> to vector<4x128xf32>
    %172 = arith.mulf %170, %171 : vector<4x128xf32>
    %173 = vector.extract_strided_slice %167 {offsets = [0, 1], sizes = [4, 1], strides = [1, 1]} : vector<4x4xf32> to vector<4x1xf32>
    %174 = vector.extract_strided_slice %165 {offsets = [1, 0], sizes = [1, 128], strides = [1, 1]} : vector<4x128xf32> to vector<1x128xf32>
    %175 = vector.broadcast %173 : vector<4x1xf32> to vector<4x128xf32>
    %176 = vector.broadcast %174 : vector<1x128xf32> to vector<4x128xf32>
    %177 = arith.mulf %175, %176 : vector<4x128xf32>
    %178 = arith.addf %172, %177 : vector<4x128xf32>
    %179 = vector.extract_strided_slice %167 {offsets = [0, 2], sizes = [4, 1], strides = [1, 1]} : vector<4x4xf32> to vector<4x1xf32>
    %180 = vector.extract_strided_slice %165 {offsets = [2, 0], sizes = [1, 128], strides = [1, 1]} : vector<4x128xf32> to vector<1x128xf32>
    %181 = vector.broadcast %179 : vector<4x1xf32> to vector<4x128xf32>
    %182 = vector.broadcast %180 : vector<1x128xf32> to vector<4x128xf32>
    %183 = arith.mulf %181, %182 : vector<4x128xf32>
    %184 = arith.addf %178, %183 : vector<4x128xf32>
    %185 = vector.extract_strided_slice %167 {offsets = [0, 3], sizes = [4, 1], strides = [1, 1]} : vector<4x4xf32> to vector<4x1xf32>
    %186 = vector.extract_strided_slice %165 {offsets = [3, 0], sizes = [1, 128], strides = [1, 1]} : vector<4x128xf32> to vector<1x128xf32>
    %187 = vector.broadcast %185 : vector<4x1xf32> to vector<4x128xf32>
    %188 = vector.broadcast %186 : vector<1x128xf32> to vector<4x128xf32>
    %189 = arith.mulf %187, %188 : vector<4x128xf32>
    %190 = arith.addf %184, %189 : vector<4x128xf32>
    %191 = arith.addf %164, %190 : vector<4x128xf32>
    %192 = vector.extract_strided_slice %46 {offsets = [0, 18], sizes = [4, 128], strides = [1, 1]} : vector<4x162xf32> to vector<4x128xf32>
    %193 = vector.broadcast %48 : vector<1x128xf32> to vector<4x128xf32>
    %194 = arith.mulf %192, %193 : vector<4x128xf32>
    %195 = vector.extract_strided_slice %49 {offsets = [5, 0, 0], sizes = [1, 4, 4], strides = [1, 1, 1]} : vector<9x4x4xf32> to vector<1x4x4xf32>
    %196 = vector.shape_cast %195 : vector<1x4x4xf32> to vector<4x4xf32>
    %197 = vector.extract_strided_slice %196 {offsets = [0, 0], sizes = [4, 1], strides = [1, 1]} : vector<4x4xf32> to vector<4x1xf32>
    %198 = vector.extract_strided_slice %194 {offsets = [0, 0], sizes = [1, 128], strides = [1, 1]} : vector<4x128xf32> to vector<1x128xf32>
    %199 = vector.broadcast %197 : vector<4x1xf32> to vector<4x128xf32>
    %200 = vector.broadcast %198 : vector<1x128xf32> to vector<4x128xf32>
    %201 = arith.mulf %199, %200 : vector<4x128xf32>
    %202 = vector.extract_strided_slice %196 {offsets = [0, 1], sizes = [4, 1], strides = [1, 1]} : vector<4x4xf32> to vector<4x1xf32>
    %203 = vector.extract_strided_slice %194 {offsets = [1, 0], sizes = [1, 128], strides = [1, 1]} : vector<4x128xf32> to vector<1x128xf32>
    %204 = vector.broadcast %202 : vector<4x1xf32> to vector<4x128xf32>
    %205 = vector.broadcast %203 : vector<1x128xf32> to vector<4x128xf32>
    %206 = arith.mulf %204, %205 : vector<4x128xf32>
    %207 = arith.addf %201, %206 : vector<4x128xf32>
    %208 = vector.extract_strided_slice %196 {offsets = [0, 2], sizes = [4, 1], strides = [1, 1]} : vector<4x4xf32> to vector<4x1xf32>
    %209 = vector.extract_strided_slice %194 {offsets = [2, 0], sizes = [1, 128], strides = [1, 1]} : vector<4x128xf32> to vector<1x128xf32>
    %210 = vector.broadcast %208 : vector<4x1xf32> to vector<4x128xf32>
    %211 = vector.broadcast %209 : vector<1x128xf32> to vector<4x128xf32>
    %212 = arith.mulf %210, %211 : vector<4x128xf32>
    %213 = arith.addf %207, %212 : vector<4x128xf32>
    %214 = vector.extract_strided_slice %196 {offsets = [0, 3], sizes = [4, 1], strides = [1, 1]} : vector<4x4xf32> to vector<4x1xf32>
    %215 = vector.extract_strided_slice %194 {offsets = [3, 0], sizes = [1, 128], strides = [1, 1]} : vector<4x128xf32> to vector<1x128xf32>
    %216 = vector.broadcast %214 : vector<4x1xf32> to vector<4x128xf32>
    %217 = vector.broadcast %215 : vector<1x128xf32> to vector<4x128xf32>
    %218 = arith.mulf %216, %217 : vector<4x128xf32>
    %219 = arith.addf %213, %218 : vector<4x128xf32>
    %220 = arith.addf %191, %219 : vector<4x128xf32>
    %221 = vector.extract_strided_slice %46 {offsets = [0, 32], sizes = [4, 128], strides = [1, 1]} : vector<4x162xf32> to vector<4x128xf32>
    %222 = vector.broadcast %47 : vector<1x128xf32> to vector<4x128xf32>
    %223 = arith.mulf %221, %222 : vector<4x128xf32>
    %224 = vector.extract_strided_slice %49 {offsets = [6, 0, 0], sizes = [1, 4, 4], strides = [1, 1, 1]} : vector<9x4x4xf32> to vector<1x4x4xf32>
    %225 = vector.shape_cast %224 : vector<1x4x4xf32> to vector<4x4xf32>
    %226 = vector.extract_strided_slice %225 {offsets = [0, 0], sizes = [4, 1], strides = [1, 1]} : vector<4x4xf32> to vector<4x1xf32>
    %227 = vector.extract_strided_slice %223 {offsets = [0, 0], sizes = [1, 128], strides = [1, 1]} : vector<4x128xf32> to vector<1x128xf32>
    %228 = vector.broadcast %226 : vector<4x1xf32> to vector<4x128xf32>
    %229 = vector.broadcast %227 : vector<1x128xf32> to vector<4x128xf32>
    %230 = arith.mulf %228, %229 : vector<4x128xf32>
    %231 = vector.extract_strided_slice %225 {offsets = [0, 1], sizes = [4, 1], strides = [1, 1]} : vector<4x4xf32> to vector<4x1xf32>
    %232 = vector.extract_strided_slice %223 {offsets = [1, 0], sizes = [1, 128], strides = [1, 1]} : vector<4x128xf32> to vector<1x128xf32>
    %233 = vector.broadcast %231 : vector<4x1xf32> to vector<4x128xf32>
    %234 = vector.broadcast %232 : vector<1x128xf32> to vector<4x128xf32>
    %235 = arith.mulf %233, %234 : vector<4x128xf32>
    %236 = arith.addf %230, %235 : vector<4x128xf32>
    %237 = vector.extract_strided_slice %225 {offsets = [0, 2], sizes = [4, 1], strides = [1, 1]} : vector<4x4xf32> to vector<4x1xf32>
    %238 = vector.extract_strided_slice %223 {offsets = [2, 0], sizes = [1, 128], strides = [1, 1]} : vector<4x128xf32> to vector<1x128xf32>
    %239 = vector.broadcast %237 : vector<4x1xf32> to vector<4x128xf32>
    %240 = vector.broadcast %238 : vector<1x128xf32> to vector<4x128xf32>
    %241 = arith.mulf %239, %240 : vector<4x128xf32>
    %242 = arith.addf %236, %241 : vector<4x128xf32>
    %243 = vector.extract_strided_slice %225 {offsets = [0, 3], sizes = [4, 1], strides = [1, 1]} : vector<4x4xf32> to vector<4x1xf32>
    %244 = vector.extract_strided_slice %223 {offsets = [3, 0], sizes = [1, 128], strides = [1, 1]} : vector<4x128xf32> to vector<1x128xf32>
    %245 = vector.broadcast %243 : vector<4x1xf32> to vector<4x128xf32>
    %246 = vector.broadcast %244 : vector<1x128xf32> to vector<4x128xf32>
    %247 = arith.mulf %245, %246 : vector<4x128xf32>
    %248 = arith.addf %242, %247 : vector<4x128xf32>
    %249 = arith.addf %220, %248 : vector<4x128xf32>
    %250 = vector.extract_strided_slice %46 {offsets = [0, 33], sizes = [4, 128], strides = [1, 1]} : vector<4x162xf32> to vector<4x128xf32>
    %251 = vector.extract_strided_slice %49 {offsets = [7, 0, 0], sizes = [1, 4, 4], strides = [1, 1, 1]} : vector<9x4x4xf32> to vector<1x4x4xf32>
    %252 = vector.shape_cast %251 : vector<1x4x4xf32> to vector<4x4xf32>
    %253 = vector.extract_strided_slice %252 {offsets = [0, 0], sizes = [4, 1], strides = [1, 1]} : vector<4x4xf32> to vector<4x1xf32>
    %254 = vector.extract_strided_slice %250 {offsets = [0, 0], sizes = [1, 128], strides = [1, 1]} : vector<4x128xf32> to vector<1x128xf32>
    %255 = vector.broadcast %253 : vector<4x1xf32> to vector<4x128xf32>
    %256 = vector.broadcast %254 : vector<1x128xf32> to vector<4x128xf32>
    %257 = arith.mulf %255, %256 : vector<4x128xf32>
    %258 = vector.extract_strided_slice %252 {offsets = [0, 1], sizes = [4, 1], strides = [1, 1]} : vector<4x4xf32> to vector<4x1xf32>
    %259 = vector.extract_strided_slice %250 {offsets = [1, 0], sizes = [1, 128], strides = [1, 1]} : vector<4x128xf32> to vector<1x128xf32>
    %260 = vector.broadcast %258 : vector<4x1xf32> to vector<4x128xf32>
    %261 = vector.broadcast %259 : vector<1x128xf32> to vector<4x128xf32>
    %262 = arith.mulf %260, %261 : vector<4x128xf32>
    %263 = arith.addf %257, %262 : vector<4x128xf32>
    %264 = vector.extract_strided_slice %252 {offsets = [0, 2], sizes = [4, 1], strides = [1, 1]} : vector<4x4xf32> to vector<4x1xf32>
    %265 = vector.extract_strided_slice %250 {offsets = [2, 0], sizes = [1, 128], strides = [1, 1]} : vector<4x128xf32> to vector<1x128xf32>
    %266 = vector.broadcast %264 : vector<4x1xf32> to vector<4x128xf32>
    %267 = vector.broadcast %265 : vector<1x128xf32> to vector<4x128xf32>
    %268 = arith.mulf %266, %267 : vector<4x128xf32>
    %269 = arith.addf %263, %268 : vector<4x128xf32>
    %270 = vector.extract_strided_slice %252 {offsets = [0, 3], sizes = [4, 1], strides = [1, 1]} : vector<4x4xf32> to vector<4x1xf32>
    %271 = vector.extract_strided_slice %250 {offsets = [3, 0], sizes = [1, 128], strides = [1, 1]} : vector<4x128xf32> to vector<1x128xf32>
    %272 = vector.broadcast %270 : vector<4x1xf32> to vector<4x128xf32>
    %273 = vector.broadcast %271 : vector<1x128xf32> to vector<4x128xf32>
    %274 = arith.mulf %272, %273 : vector<4x128xf32>
    %275 = arith.addf %269, %274 : vector<4x128xf32>
    %276 = arith.addf %249, %275 : vector<4x128xf32>
    %277 = vector.extract_strided_slice %46 {offsets = [0, 34], sizes = [4, 128], strides = [1, 1]} : vector<4x162xf32> to vector<4x128xf32>
    %278 = vector.broadcast %48 : vector<1x128xf32> to vector<4x128xf32>
    %279 = arith.mulf %277, %278 : vector<4x128xf32>
    %280 = vector.extract_strided_slice %49 {offsets = [8, 0, 0], sizes = [1, 4, 4], strides = [1, 1, 1]} : vector<9x4x4xf32> to vector<1x4x4xf32>
    %281 = vector.shape_cast %280 : vector<1x4x4xf32> to vector<4x4xf32>
    %282 = vector.extract_strided_slice %281 {offsets = [0, 0], sizes = [4, 1], strides = [1, 1]} : vector<4x4xf32> to vector<4x1xf32>
    %283 = vector.extract_strided_slice %279 {offsets = [0, 0], sizes = [1, 128], strides = [1, 1]} : vector<4x128xf32> to vector<1x128xf32>
    %284 = vector.broadcast %282 : vector<4x1xf32> to vector<4x128xf32>
    %285 = vector.broadcast %283 : vector<1x128xf32> to vector<4x128xf32>
    %286 = arith.mulf %284, %285 : vector<4x128xf32>
    %287 = vector.extract_strided_slice %281 {offsets = [0, 1], sizes = [4, 1], strides = [1, 1]} : vector<4x4xf32> to vector<4x1xf32>
    %288 = vector.extract_strided_slice %279 {offsets = [1, 0], sizes = [1, 128], strides = [1, 1]} : vector<4x128xf32> to vector<1x128xf32>
    %289 = vector.broadcast %287 : vector<4x1xf32> to vector<4x128xf32>
    %290 = vector.broadcast %288 : vector<1x128xf32> to vector<4x128xf32>
    %291 = arith.mulf %289, %290 : vector<4x128xf32>
    %292 = arith.addf %286, %291 : vector<4x128xf32>
    %293 = vector.extract_strided_slice %281 {offsets = [0, 2], sizes = [4, 1], strides = [1, 1]} : vector<4x4xf32> to vector<4x1xf32>
    %294 = vector.extract_strided_slice %279 {offsets = [2, 0], sizes = [1, 128], strides = [1, 1]} : vector<4x128xf32> to vector<1x128xf32>
    %295 = vector.broadcast %293 : vector<4x1xf32> to vector<4x128xf32>
    %296 = vector.broadcast %294 : vector<1x128xf32> to vector<4x128xf32>
    %297 = arith.mulf %295, %296 : vector<4x128xf32>
    %298 = arith.addf %292, %297 : vector<4x128xf32>
    %299 = vector.extract_strided_slice %281 {offsets = [0, 3], sizes = [4, 1], strides = [1, 1]} : vector<4x4xf32> to vector<4x1xf32>
    %300 = vector.extract_strided_slice %279 {offsets = [3, 0], sizes = [1, 128], strides = [1, 1]} : vector<4x128xf32> to vector<1x128xf32>
    %301 = vector.broadcast %299 : vector<4x1xf32> to vector<4x128xf32>
    %302 = vector.broadcast %300 : vector<1x128xf32> to vector<4x128xf32>
    %303 = arith.mulf %301, %302 : vector<4x128xf32>
    %304 = arith.addf %298, %303 : vector<4x128xf32>
    %305 = arith.addf %276, %304 : vector<4x128xf32>
    %306 = vector.broadcast %6 : vector<4x1xf32> to vector<4x128xf32>
    %307 = arith.addf %305, %306 : vector<4x128xf32>
    %cst_19 = arith.constant 0.000000e+00 : f32
    %308 = vector.broadcast %cst_19 : f32 to vector<4x128xf32>
    %309 = arith.maximumf %307, %308 : vector<4x128xf32>
    %c0_20 = arith.constant 0 : index
    %c0_21 = arith.constant 0 : index
    %310 = vector.load %arg5[%c0_20, %c0_21] : memref<4x4xf32, #tpu.memory_space<vmem>>, vector<4x4xf32>
    %311 = vector.extract_strided_slice %310 {offsets = [0, 0], sizes = [4, 1], strides = [1, 1]} : vector<4x4xf32> to vector<4x1xf32>
    %312 = vector.extract_strided_slice %309 {offsets = [0, 0], sizes = [1, 128], strides = [1, 1]} : vector<4x128xf32> to vector<1x128xf32>
    %313 = vector.broadcast %311 : vector<4x1xf32> to vector<4x128xf32>
    %314 = vector.broadcast %312 : vector<1x128xf32> to vector<4x128xf32>
    %315 = arith.mulf %313, %314 : vector<4x128xf32>
    %316 = vector.extract_strided_slice %310 {offsets = [0, 1], sizes = [4, 1], strides = [1, 1]} : vector<4x4xf32> to vector<4x1xf32>
    %317 = vector.extract_strided_slice %309 {offsets = [1, 0], sizes = [1, 128], strides = [1, 1]} : vector<4x128xf32> to vector<1x128xf32>
    %318 = vector.broadcast %316 : vector<4x1xf32> to vector<4x128xf32>
    %319 = vector.broadcast %317 : vector<1x128xf32> to vector<4x128xf32>
    %320 = arith.mulf %318, %319 : vector<4x128xf32>
    %321 = arith.addf %315, %320 : vector<4x128xf32>
    %322 = vector.extract_strided_slice %310 {offsets = [0, 2], sizes = [4, 1], strides = [1, 1]} : vector<4x4xf32> to vector<4x1xf32>
    %323 = vector.extract_strided_slice %309 {offsets = [2, 0], sizes = [1, 128], strides = [1, 1]} : vector<4x128xf32> to vector<1x128xf32>
    %324 = vector.broadcast %322 : vector<4x1xf32> to vector<4x128xf32>
    %325 = vector.broadcast %323 : vector<1x128xf32> to vector<4x128xf32>
    %326 = arith.mulf %324, %325 : vector<4x128xf32>
    %327 = arith.addf %321, %326 : vector<4x128xf32>
    %328 = vector.extract_strided_slice %310 {offsets = [0, 3], sizes = [4, 1], strides = [1, 1]} : vector<4x4xf32> to vector<4x1xf32>
    %329 = vector.extract_strided_slice %309 {offsets = [3, 0], sizes = [1, 128], strides = [1, 1]} : vector<4x128xf32> to vector<1x128xf32>
    %330 = vector.broadcast %328 : vector<4x1xf32> to vector<4x128xf32>
    %331 = vector.broadcast %329 : vector<1x128xf32> to vector<4x128xf32>
    %332 = arith.mulf %330, %331 : vector<4x128xf32>
    %333 = arith.addf %327, %332 : vector<4x128xf32>
    %334 = vector.broadcast %7 : vector<4x1xf32> to vector<4x128xf32>
    %335 = arith.addf %333, %334 : vector<4x128xf32>
    %cst_22 = arith.constant 0.000000e+00 : f32
    %336 = vector.broadcast %cst_22 : f32 to vector<4x128xf32>
    %337 = arith.maximumf %335, %336 : vector<4x128xf32>
    %338 = vector.extract_strided_slice %1 {offsets = [0, 16], sizes = [4, 128], strides = [1, 1]} : vector<4x160xf32> to vector<4x128xf32>
    %339 = arith.addf %338, %337 : vector<4x128xf32>
    %340 = vector.shape_cast %339 : vector<4x128xf32> to vector<1x4x128xf32>
    %c0_23 = arith.constant 0 : index
    %c0_24 = arith.constant 0 : index
    %c0_25 = arith.constant 0 : index
    %341 = vector.load %arg9[%c0_23, %c0_24, %c0_25] : memref<1x4x128xf32, #tpu.memory_space<vmem>>, vector<1x4x128xf32>
    tpu.vector_store %arg9[%c0_23, %c0_24, %c0_25], %340 {strides = array<i32>} : memref<1x4x128xf32, #tpu.memory_space<vmem>>, vector<1x4x128xf32>,
    return
  }
  func.func @transform_0(%arg0: i32, %arg1: i32) -> (i32, i32, i32, i32) {
    %c0_i32 = arith.constant 0 : i32
    %c0_i32_0 = arith.constant 0 : i32
    %c0_i32_1 = arith.constant 0 : i32
    return %arg0, %arg1, %c0_i32, %c0_i32_0 : i32, i32, i32, i32
  }
  func.func @transform_1(%arg0: i32, %arg1: i32) -> (i32, i32) {
    %c0_i32 = arith.constant 0 : i32
    %c0_i32_0 = arith.constant 0 : i32
    %c0_i32_1 = arith.constant 0 : i32
    return %c0_i32, %c0_i32_0 : i32, i32
  }
  func.func @transform_2(%arg0: i32, %arg1: i32) -> (i32, i32, i32) {
    %c0_i32 = arith.constant 0 : i32
    %c0_i32_0 = arith.constant 0 : i32
    %c0_i32_1 = arith.constant 0 : i32
    %c0_i32_2 = arith.constant 0 : i32
    return %c0_i32, %c0_i32_0, %c0_i32_1 : i32, i32, i32
  }
  func.func @transform_3(%arg0: i32, %arg1: i32) -> (i32, i32) {
    %c0_i32 = arith.constant 0 : i32
    %c0_i32_0 = arith.constant 0 : i32
    %c0_i32_1 = arith.constant 0 : i32
    return %c0_i32, %c0_i32_0 : i32, i32
  }
  func.func @transform_4(%arg0: i32, %arg1: i32) -> (i32, i32) {
    %c0_i32 = arith.constant 0 : i32
    %c0_i32_0 = arith.constant 0 : i32
    %c0_i32_1 = arith.constant 0 : i32
    return %c0_i32, %c0_i32_0 : i32, i32
  }
  func.func @transform_5(%arg0: i32, %arg1: i32) -> (i32, i32, i32) {
    %c0_i32 = arith.constant 0 : i32
    %c0_i32_0 = arith.constant 0 : i32
    %c0_i32_1 = arith.constant 0 : i32
    return %arg1, %c0_i32, %c0_i32_0 : i32, i32, i32
  }
  func.func @transform_6(%arg0: i32, %arg1: i32) -> (i32, i32) {
    %c0_i32 = arith.constant 0 : i32
    %c0_i32_0 = arith.constant 0 : i32
    %c0_i32_1 = arith.constant 0 : i32
    return %c0_i32, %c0_i32_0 : i32, i32
  }
  func.func @transform_7(%arg0: i32, %arg1: i32) -> (i32, i32, i32) {
    %c0_i32 = arith.constant 0 : i32
    %c0_i32_0 = arith.constant 0 : i32
    return %arg0, %c0_i32, %arg1 : i32, i32, i32
  }
}

</mosaic_0001>

<bundles_post_ra>
// kernel: conv_block.1
= control target key start
LH: loop header
LB: loop body
LE: loop exit
PB: predicated region body
PF: predicated region fallthrough
CT: control target
= control target key end

     0   :  { %s1478_s24 = smov 0   ;;  %s1480_s25 = smov 0   ;;  %s1968_s0 = inlined_call_operand.vmem [shape: f32[2,2,4,160], index: 0, kind: input, shape index: {}]   ;;  %s1969_s1 = inlined_call_operand.vmem [shape: f32[4,4], index: 1, kind: input, shape index: {}]   ;;  %s1970_s2 = inlined_call_operand.vmem [shape: f32[9,4,4], index: 2, kind: input, shape index: {}]   ;;  %s1971_s3 = inlined_call_operand.vmem [shape: f32[4,4], index: 3, kind: input, shape index: {}]   ;;  %s1972_s4 = inlined_call_operand.vmem [shape: f32[4,5], index: 4, kind: input, shape index: {}]   ;;  %s1973_s5 = inlined_call_operand.vmem [shape: f32[2,1,160], index: 5, kind: input, shape index: {}]   ;;  %s1974_s6 = inlined_call_operand.vmem [shape: f32[2,128], index: 6, kind: input, shape index: {}]   ;;  %s1975_s7 = inlined_call_operand.vmem [shape: f32[2,4,256], index: 7, kind: output, shape index: {}]  }
   0x1   :  { %s1482_s26 = smov 0   ;;  %s1484_s27 = smov 0  }
   0x2   :  { %s1486_s28 = smov 0  }
   0x3 LB: > { %s26_s29 = sadd.s32 1, %s1409_s26  ;;  %s29_s30 = sadd.s32 1, %s1413_s27  ;;  %s1417_s28 = sphi %s1486_s28, %s17_s28   ;;  %s1413_s27 = sphi %s1484_s27, %s1992_s27   ;;  %s1409_s26 = sphi %s1482_s26, %s1991_s26   ;;  %s1405_s25 = sphi %s1480_s25, %s1990_s25   ;;  %s1401_s24 = sphi %s1478_s24, %s1989_s24  }
   0x4   : > { %p27_p0 = scmp.ge.s32.totalorder %s26_s29, 2  ;;  %p1268_p1 = scmp.ge.s32.totalorder %s1417_s28, 1 }
   0x5   : > { %p266_p2 = scmp.lt.s32.totalorder %s1417_s28, 5 }
   0x6   : > { %s1994_s29 = smov (%p27_p0, %s26_s29), 0  ;;  %s1996_s30 = smov (!%p27_p0, %s29_s30), %s1413_s27 }
   0x7   : > { %p267_p3 = pnand %p1268_p1, %p266_p2  ;;  %p31_p4 = scmp.ge.s32.totalorder %s1996_s30, 2 }
   0x9   : > { %s1998_s30 = smov (%p31_p4, %s1996_s30), 0  ;;  %270 = sbr.rel (%p267_p3) target bundleno = 738 (0x2e2), region = 48 }
  0x10   : > { %v332_v0 = vld [vmem:[%s1969_s1] sm:$0xf]  ;;  %v1419_v1 = vmov 0   ;;  %v1977_v2 = vmov 2   ;;  %v1421_v3 = vmov 1   ;;  %v1976_v4 = vmov 3  }
  0x11   : > { %1338 = vset.pattern.permute.xlu0 %v1419_v1  ;;  %1340 = vset.pattern.permute.xlu1 %v1977_v2  ;;  %v1522_v5 = vld [vmem:[%s1972_s4] sm:$0xf]  ;;  %v488_v6 = vld [vmem:[%s1970_s2 + $0x4] sm:$0xf]  ;;  %v489_v7 = vld [vmem:[%s1970_s2 + $0x8] sm:$0xf]  ;;  %v339_v15 = vlaneseq }
  0x12   : > { %335 = vperm.xlu0 %1338, %v332_v0   ;;  %386 = vperm.xlu1 %1340, %v332_v0   ;;  %1981 = vst [vmem:[#allocation2_spill] sm:$0xff] %v1522_v5  ;;  %v1542_v8 = vld [vmem:[%s1974_s6] ss:$0 sm:$0xff]  ;;  %s1423_s18 = smov 16   ;;  %v493_v9 = vld [vmem:[%s1970_s2 + $0x18] sm:$0xf] }
  0x13   : > { %1982 = vst [vmem:[#allocation3_spill] sm:$0xff] %v1542_v8  ;;  %v490_v10 = vld [vmem:[%s1970_s2 + $0xc] sm:$0xf]  ;;  %v1559_v11 = vld [vmem:[%s1970_s2 + $0x14] sm:$0xf]  ;;  %s1424_s13 = smov 2  }
  0x14   : > { %v1565_v12 = vld [vmem:[%s1974_s6 + $0x1] ss:$0 sm:$0xff]  ;;  %v1570_v13 = vld [vmem:[%s1970_s2 + $0x1c] sm:$0xf]  ;;  %v491_v14 = vld [vmem:[%s1970_s2 + $0x10] sm:$0xf] }
  0x15   : > { %s1425_s16 = smov 18   ;;  %s1426_s17 = smov 32   ;;  %v340_v16 = vshrl.u32 %v339_v15, 7  ;;  %vm478_vm0 = vcmask 7168   ;;  %vm483_vm1 = vcmask 269312   ;;  %vm611_vm2 = vcmask 1039360  }
  0x16   : > { %1339 = vset.pattern.permute.xlu0 %v1421_v3  ;;  %1341 = vset.pattern.permute.xlu1 %v1976_v4  ;;  %p309_p5 = scmp.lt.s32.totalorder %s1405_s25, 1  ;;  %p311_p6 = scmp.lt.s32.totalorder %s1401_s24, 1  ;;  %vm694_vm3 = vcmask 1031168   ;;  %vm773_vm4 = vcmask 916480   ;;  %vm814_vm5 = vcmask 908288   ;;  %vm892_vm6 = vcmask 900096  }
  0x17   : > { %360 = vperm.xlu0 %1339, %v332_v0   ;;  %412 = vperm.xlu1 %1341, %v332_v0   ;;  %v1610_v17 = vsub.s32 0, %v340_v16  ;;  %v345_v18 = vsub.s32 4, %v340_v16  ;;  %v1612_v19 = vsub.s32 1, %v340_v16  ;;  %v369_v20 = vsub.s32 5, %v340_v16  ;;  %s1432_s23 = smov 112   ;;  %s1433_s8 = smov 110  }
  0x18   : > { %s2000_s25 = smov (!%p309_p5, %s1405_s25), 1  ;;  %s2002_s24 = smov (!%p311_p6, %s1401_s24), 1  ;;  %v1616_v22 = vsub.s32 2, %v340_v16  ;;  %v395_v23 = vsub.s32 6, %v340_v16  ;;  %v1618_v24 = vsub.s32 3, %v340_v16  ;;  %v421_v25 = vsub.s32 7, %v340_v16 }
  0x19   : > { %s1269_s19 = sshll.u32 %s2002_s24, 1  ;;  %s1270_s20 = sshll.u32 %s2000_s25, 2  ;;  %vm970_vm7 = vcmask 785408   ;;  %vm1011_vm8 = vcmask 777216   ;;  %vm1089_vm9 = vcmask 769024   ;;  %vm1150_vm10 = vcmask 130048  }
  0x1a   : > { %s315_s21 = sadd.s32 %s1270_s20, %s1269_s19  ;;  %s321_s12 = scalar_lea.vmem %s1973_s5, %s1269_s19 }
  0x1b   : > { %448 = vperm.xlu0 %1339, %v1522_v5   ;;  %1342 = vset.pattern.permute.xlu1 %v1419_v1  ;;  %s1271_s22 = sshll.u32 %s315_s21, 2  ;;  %v446_v63 = vld [vmem:[%s321_s12] sm:$0x3]  ;;  %s1429_s20 = smov 127  }
  0x1c   : > { %439 = vperm.xlu1 %1342, %v1522_v5   ;;  %s317_s9 = scalar_lea.vmem %s1968_s0, %s1271_s22  ;;  %v463_v15 = vrot.slane %v446_v63, %v1610_v17  ;;  %v467_v16 = vrot.slane %v446_v63, %v1612_v19  ;;  %s1430_s21 = smov 111  }
  0x1d   : > { %v1614_v21 = vld [vmem:[%s317_s9] sm:$0xff]  ;;  %s1431_s22 = smov 126   ;;  %s1434_s9 = smov 95  }
  0x1e   : > { %1983 = vst [vmem:[#allocation4_spill] sm:$0xff] %v1614_v21  ;;  %v342_v26 = vrot.slane %v1614_v21, %v1610_v17  ;;  %v346_v27 = vrot.slane %v1614_v21, %v345_v18  ;;  %v366_v28 = vrot.slane %v1614_v21, %v1612_v19  ;;  %v370_v29 = vrot.slane %v1614_v21, %v369_v20  ;;  %s1435_s10 = smov 96   ;;  %s1436_s11 = smov 94  }
  0x1f   : > { %1347 = vset.pattern.permute.xlu0 %v1976_v4  ;;  %v392_v30 = vrot.slane %v1614_v21, %v1616_v22  ;;  %v396_v31 = vrot.slane %v1614_v21, %v395_v23  ;;  %v418_v34 = vrot.slane %v1614_v21, %v1618_v24  ;;  %v422_v35 = vrot.slane %v1614_v21, %v421_v25  ;;  %s1273_s14 = sshll.u32 %s2000_s25, 1 }
  0x20   : > { %1343 = vset.pattern.permute.xlu1 %v1977_v2  ;;  %590 = vperm.xlu0 %1347, %v488_v6   ;;  %v352_v36 = vrot.slane %v342_v26, %v1610_v17  ;;  %v356_v37 = vrot.slane %v346_v27, %v1610_v17  ;;  %v376_v38 = vrot.slane %v366_v28, %v1612_v19  ;;  %v495_v27 = vld [vmem:[%s1970_s2 + $0x20] sm:$0xf]  ;;  %s327_s15 = sadd.s32 %s1273_s14, %s2002_s24 }
  0x21   : > { %454 = vperm.xlu1 %1343, %v1522_v5   ;;  %v380_v39 = vrot.slane %v370_v29, %v1612_v19  ;;  %v402_v40 = vrot.slane %v392_v30, %v1616_v22  ;;  %v406_v41 = vrot.slane %v396_v31, %v1616_v22  ;;  %v428_v42 = vrot.slane %v418_v34, %v1618_v24  ;;  %v487_v31 = vld [vmem:[%s1970_s2] sm:$0xf] }
  0x22   : > { %v432_v43 = vrot.slane %v422_v35, %v1618_v24 }
  0x24   : > { %1348 = vset.pattern.permute.xlu0 %v1419_v1 }
  0x25   : > { %1344 = vset.pattern.permute.xlu1 %v1421_v3  ;;  %544 = vperm.xlu0 %1348, %v488_v6  }
  0x26   : > { %558 = vperm.xlu1 %1344, %v488_v6  }
  0x29   : > { %627 = vperm.xlu0 %1348, %v489_v7  }
  0x2a   : > { %1345 = vset.pattern.permute.xlu1 %v1977_v2 }
  0x2b   : > { %574 = vperm.xlu1 %1345, %v488_v6  }
  0x2d   : > { %699 = vrot.lane.b32.xlu0 %v1542_v8, %s1423_s18 }
  0x2f   : > { %1346 = vset.pattern.permute.xlu1 %v1421_v3 }
  0x30   : > { %641 = vperm.xlu1 %1346, %v489_v7  }
  0x31   : > { %903 = vperm.xlu0 %1348, %v493_v9  }
  0x34   : > { %1349 = vset.pattern.permute.xlu1 %v1977_v2 }
  0x35   : > { %657 = vperm.xlu1 %1349, %v489_v7   ;;  %1358 = vset.pattern.permute.xlu0 %v1421_v3 }
  0x36   : > { %720 = vperm.xlu0 %1358, %v490_v10  }
  0x39   : > { %1350 = vset.pattern.permute.xlu1 %v1419_v1 }
  0x3a   : > { %706 = vperm.xlu1 %1350, %v490_v10   ;;  %839 = vperm.xlu0 %1358, %v1559_v11  }
  0x3e   : > { %620 = vrot.lane.b32.xlu1 %v1565_v12, %s1424_s13  ;;  %982 = vperm.xlu0 %1358, %v1570_v13   ;;  %s1427_s13 = smov 1  }
  0x3f   : > { %1351 = vset.pattern.permute.xlu1 %v1976_v4 }
  0x42   : > { %673 = vperm.xlu1 %1351, %v489_v7   ;;  %1362 = vset.pattern.permute.xlu0 %v1977_v2 }
  0x43   : > { %736 = vperm.xlu0 %1362, %v490_v10  }
  0x46   : > { %1352 = vset.pattern.permute.xlu1 %v1419_v1 }
  0x47   : > { %779 = vperm.xlu1 %1352, %v491_v14   ;;  %793 = vperm.xlu0 %1362, %v491_v14  }
  0x4b   : > { %1353 = vset.pattern.permute.xlu1 %v1421_v3 }
  0x4c   : > { %785 = vperm.xlu1 %1353, %v491_v14  }
  0x50   : > { %1354 = vset.pattern.permute.xlu1 %v1976_v4 }
  0x51   : > { %752 = vperm.xlu1 %1354, %v490_v10  }
  0x55   : > { %1355 = vset.pattern.permute.xlu1 %v1419_v1 }
  0x56   : > { %825 = vperm.xlu1 %1355, %v1559_v11  }
  0x5a   : > { %1356 = vset.pattern.permute.xlu1 %v1976_v4 }
  0x5b   : > { %801 = vperm.xlu1 %1356, %v491_v14  }
  0x5f   : > { %1357 = vset.pattern.permute.xlu1 %v1977_v2 }
  0x60   : > { %855 = vperm.xlu1 %1357, %v1559_v11  }
  0x64   : > { %1359 = vset.pattern.permute.xlu1 %v1421_v3 }
  0x65   : > { %917 = vperm.xlu1 %1359, %v493_v9  }
  0x69   : > { %818 = vrot.lane.b32.xlu1 %v1565_v12, %s1425_s16  ;;  %s1428_s16 = smov 34  }
  0x6a   : > { %1360 = vset.pattern.permute.xlu1 %v1977_v2 }
  0x6d   : > { %933 = vperm.xlu1 %1360, %v493_v9  }
  0x71   : > { %1361 = vset.pattern.permute.xlu1 %v1419_v1 }
  0x72   : > { %976 = vperm.xlu1 %1361, %v1570_v13  }
  0x76   : > { %896 = vrot.lane.b32.xlu1 %v1542_v8, %s1426_s17 }
  0x77   : > { %1363 = vset.pattern.permute.xlu1 %v1976_v4 }
  0x7a   : > { %949 = vperm.xlu1 %1363, %v493_v9  }
  0x7e   : > { %1365 = vset.pattern.permute.xlu1 %v1419_v1 }
  0x91   : > { %v336_v32 = vpop.permute.xlu0 %335  ;;  %v387_v33 = vpop.permute.xlu1 %386 }
  0x92   : > { %v357_v46 = vmul.f32 %v352_v36, %v336_v32  ;;  %v358_v47 = vmul.f32 %v356_v37, %v336_v32  ;;  %v407_v50 = vmul.f32 %v402_v40, %v387_v33  ;;  %v408_v51 = vmul.f32 %v406_v41, %v387_v33 }
  0x96   : > { %v361_v44 = vpop.permute.xlu0 %360  ;;  %v413_v45 = vpop.permute.xlu1 %412 }
  0x97   : > { %v381_v48 = vmul.f32 %v376_v38, %v361_v44  ;;  %v382_v49 = vmul.f32 %v380_v39, %v361_v44  ;;  %v433_v54 = vmul.f32 %v428_v42, %v413_v45  ;;  %v434_v55 = vmul.f32 %v432_v43, %v413_v45 }
  0x99   : > { %v383_v52 = vadd.f32 %v381_v48, %v357_v46  ;;  %v384_v53 = vadd.f32 %v382_v49, %v358_v47 }
  0x9a   : > { %v449_v7 = vpop.permute.xlu0 %448 }
  0x9b   : > { %v409_v56 = vadd.f32 %v407_v50, %v383_v52  ;;  %v410_v57 = vadd.f32 %v408_v51, %v384_v53  ;;  %v440_v58 = vpop.permute.xlu1 %439 }
  0x9d   : > { %v435_v59 = vadd.f32 %v433_v54, %v409_v56  ;;  %v436_v60 = vadd.f32 %v434_v55, %v410_v57 }
  0x9f   : > { %v442_v61 = vadd.f32 %v440_v58, %v435_v59  ;;  %v443_v62 = vadd.f32 %v440_v58, %v436_v60  ;;  %v1686_v34 = vpop.permute.xlu0 %590 }
  0xa0   : > { %v455_v9 = vpop.permute.xlu1 %454 }
  0xa1   : > { %v444_v0 = vmax.f32 %v442_v61, 0.0  ;;  %v445_v6 = vmax.f32 %v443_v62, 0.0 }
  0xa3   : > { %v451_v10 = vmul.f32 %v449_v7, %v444_v0  ;;  %v452_v14 = vmul.f32 %v449_v7, %v445_v6 }
  0xa4   : > { %v1690_v36 = vpop.permute.xlu0 %544 }
  0xa5   : > { %v457_v18 = vadd.f32 %v455_v9, %v451_v10  ;;  %v458_v20 = vadd.f32 %v455_v9, %v452_v14  ;;  %v1647_v26 = vpop.permute.xlu1 %558 }
  0xa7   : > { %v470_v23 = vmul.f32 %v463_v15, %v457_v18  ;;  %v471_v25 = vmul.f32 %v467_v16, %v458_v20 }
  0xa8   : > { %v1694_v38 = vpop.permute.xlu0 %627 }
  0xa9   : > { %476 = vrot.lane.b32.xlu1 %v471_v25, %s1427_s13  ;;  %474 = vrot.lane.b32.xlu0 %v470_v23, %s1427_s13 }
  0xaa   : > { %v1653_v28 = vpop.permute.xlu1 %574 }
  0xac   : > { %v1698_v39 = vpop.permute.xlu0 %699 }
  0xad   : > { %1022 = vperm.xlu1 %1365, %v495_v27   ;;  %990 = vperm.xlu0 %1362, %v1570_v13  }
  0xaf   : > { %v1658_v29 = vpop.permute.xlu1 %641 }
  0xb1   : > { %1366 = vset.pattern.permute.xlu1 %v1421_v3  ;;  %1364 = vset.pattern.permute.xlu0 %v1976_v4 }
  0xb2   : > { %1036 = vperm.xlu1 %1366, %v495_v27   ;;  %871 = vperm.xlu0 %1364, %v1559_v11  }
  0xb4   : > { %v1663_v30 = vpop.permute.xlu1 %657 }
  0xb6   : > { %1367 = vset.pattern.permute.xlu1 %v1977_v2  ;;  %998 = vperm.xlu0 %1364, %v1570_v13  }
  0xb7   : > { %1052 = vperm.xlu1 %1367, %v495_v27  }
  0xb9   : > { %v1670_v11 = vpop.permute.xlu1 %706 }
  0xba   : > { %1068 = vperm.xlu0 %1364, %v495_v27  }
  0xbb   : > { %1015 = vrot.lane.b32.xlu1 %v1565_v12, %s1428_s16  ;;  %s1274_s16 = sshll.u32 %s327_s15, 2 }
  0xbc   : > { %1368 = vset.pattern.permute.xlu1 %v1419_v1 }
  0xbd   : > { %v1675_v12 = vpop.permute.xlu1 %620 }
  0xbe   : > { %1369 = vset.pattern.permute.xlu0 %v1421_v3 }
  0xbf   : > { %503 = vperm.xlu1 %1368, %v487_v31   ;;  %512 = vperm.xlu0 %1369, %v487_v31  }
  0xc1   : > { %v1679_v13 = vpop.permute.xlu1 %673 }
  0xc3   : > { %1370 = vset.pattern.permute.xlu1 %v1977_v2  ;;  %1372 = vset.pattern.permute.xlu0 %v1976_v4 }
  0xc4   : > { %522 = vperm.xlu1 %1370, %v487_v31   ;;  %1094 = vperm.xlu0 %1372, %v1522_v5  }
  0xc6   : > { %v1682_v32 = vpop.permute.xlu1 %779 }
  0xc8   : > { %1371 = vset.pattern.permute.xlu1 %v1976_v4  ;;  %1373 = vset.pattern.permute.xlu0 %v1419_v1 }
  0xc9   : > { %532 = vperm.xlu1 %1371, %v487_v31  }
  0xcb   : > { %v1684_v33 = vpop.permute.xlu1 %785 }
  0xcd   : > { %1374 = vset.pattern.permute.xlu1 %v1421_v3  ;;  %v1702_v3 = vpop.permute.xlu0 %903 }
  0xd0   : > { %v1688_v35 = vpop.permute.xlu1 %752 }
  0xd1   : > { %v1706_v42 = vpop.permute.xlu0 %720 }
  0xd5   : > { %v1692_v37 = vpop.permute.xlu1 %825  ;;  %v840_v44 = vpop.permute.xlu0 %839 }
  0xd9   : > { %v1710_v46 = vpop.permute.xlu0 %982 }
  0xda   : > { %v1696_v1 = vpop.permute.xlu1 %801 }
  0xdd   : > { %v1714_v48 = vpop.permute.xlu0 %736 }
  0xdf   : > { %v1700_v40 = vpop.permute.xlu1 %855 }
  0xe1   : > { %v1718_v50 = vpop.permute.xlu0 %793 }
  0xe4   : > { %v1704_v41 = vpop.permute.xlu1 %917 }
  0xe8   : > { %v819_v43 = vpop.permute.xlu1 %818 }
  0xec   : > { %v1708_v45 = vpop.permute.xlu1 %933 }
  0xf1   : > { %v1712_v47 = vpop.permute.xlu1 %976 }
  0xf5   : > { %v1716_v49 = vpop.permute.xlu1 %896 }
  0xf9   : > { %v1720_v51 = vpop.permute.xlu1 %949 }
 0x11b   : > { %v477_v52 = vpop.permute.xlu1 %476  ;;  %v475_v53 = vpop.permute.xlu0 %474 }
 0x11c   : > { %v1722_v54 = vsel %vm478_vm0, 0.0, %v475_v53  ;;  %v479_v55 = vsel %vm478_vm0, %v475_v53, %v477_v52 }
 0x11d   : > { %v550_v56 = vrot.slane %v1722_v54, %v1610_v17  ;;  %v564_v57 = vrot.slane %v1722_v54, %v1612_v19  ;;  %v1730_v58 = vrot.slane %v1722_v54, %v1616_v22  ;;  %v1736_v61 = vrot.slane %v1722_v54, %v1618_v24 }
 0x11e   : > { %v1739_v63 = vsel %vm483_vm1, %v479_v55, 0.0  ;;  %v623_v10 = vmul.f32 %v1675_v12, %v1722_v54  ;;  %v1747_v14 = vmul.f32 %v819_v43, %v1722_v54  ;;  %v702_v27 = vmul.f32 %v1698_v39, %v1722_v54 }
 0x11f   : > { %v555_v59 = vmul.f32 %v550_v56, %v1690_v36  ;;  %v569_v60 = vmul.f32 %v564_v57, %v1647_v26  ;;  %v782_v62 = vmul.f32 %v1682_v32, %v550_v56  ;;  %v788_v0 = vmul.f32 %v1684_v33, %v564_v57 }
 0x120   : > { %v585_v7 = vmul.f32 %v1730_v58, %v1653_v28  ;;  %v601_v16 = vmul.f32 %v1736_v61, %v1686_v34  ;;  %v796_v18 = vmul.f32 %v1718_v50, %v1730_v58  ;;  %v1754_v20 = vmul.f32 %v819_v43, %v1739_v63 }
 0x121   : > { %v571_v6 = vadd.f32 %v569_v60, %v555_v59  ;;  %v790_v9 = vadd.f32 %v788_v0, %v782_v62  ;;  %v633_v23 = vrot.slane %v623_v10, %v1610_v17  ;;  %v647_v25 = vrot.slane %v623_v10, %v1612_v19 }
 0x122   : > { %v663_v53 = vrot.slane %v623_v10, %v1616_v22  ;;  %v679_v55 = vrot.slane %v623_v10, %v1618_v24  ;;  %v831_v43 = vrot.slane %v1747_v14, %v1610_v17  ;;  %v835_v62 = vrot.slane %v1754_v20, %v1610_v17 }
 0x123   : > { %v587_v15 = vadd.f32 %v585_v7, %v571_v6  ;;  %v798_v52 = vadd.f32 %v796_v18, %v790_v9  ;;  %v638_v59 = vmul.f32 %v633_v23, %v1694_v38  ;;  %v652_v60 = vmul.f32 %v647_v25, %v1658_v29 }
 0x124   : > { %v804_v0 = vmul.f32 %v1696_v1, %v1736_v61  ;;  %v1773_v6 = vrot.slane %v1739_v63, %v1610_v17  ;;  %v845_v7 = vrot.slane %v1747_v14, %v1612_v19  ;;  %v668_v10 = vmul.f32 %v663_v53, %v1663_v30 }
 0x125   : > { %v603_v31 = vadd.f32 %v601_v16, %v587_v15  ;;  %v654_v9 = vadd.f32 %v652_v60, %v638_v59  ;;  %v837_v15 = vmul.f32 %v835_v62, %v1692_v37  ;;  %v849_v16 = vrot.slane %v1754_v20, %v1612_v19 }
 0x126   : > { %v806_v18 = vadd.f32 %v804_v0, %v798_v52  ;;  %v1783_v23 = vrot.slane %v1739_v63, %v1612_v19  ;;  %v684_v25 = vmul.f32 %v679_v55, %v1679_v13  ;;  %v836_v59 = vmul.f32 %v831_v43, %v1692_v37 }
 0x127   : > { %607 = vrot.lane.b32.xlu0 %v603_v31, %s1429_s20  ;;  %v865_v31 = vrot.slane %v1754_v20, %v1616_v22  ;;  %v670_v4 = vadd.f32 %v668_v10, %v654_v9  ;;  %v851_v60 = vmul.f32 %v849_v16, %v840_v44  ;;  %v712_v53 = vrot.slane %v702_v27, %v1610_v17 }
 0x128   : > { %v850_v62 = vmul.f32 %v845_v7, %v840_v44  ;;  %v861_v52 = vrot.slane %v1747_v14, %v1616_v22  ;;  %v726_v0 = vrot.slane %v702_v27, %v1612_v19  ;;  %v742_v55 = vrot.slane %v702_v27, %v1616_v22 }
 0x129   : > { %v853_v9 = vadd.f32 %v851_v60, %v837_v15  ;;  %v867_v37 = vmul.f32 %v865_v31, %v1700_v40  ;;  %v717_v43 = vmul.f32 %v712_v53, %v1670_v11  ;;  %v758_v10 = vrot.slane %v702_v27, %v1618_v24 }
 0x12a   : > { %v1804_v44 = vrot.slane %v1739_v63, %v1616_v22  ;;  %v686_v7 = vadd.f32 %v684_v25, %v670_v4  ;;  %v731_v16 = vmul.f32 %v726_v0, %v1706_v42  ;;  %v985_v8 = vmul.f32 %v1710_v46, %v564_v57 }
 0x12b   : > { %810 = vrot.lane.b32.xlu0 %v806_v18, %s1430_s21  ;;  %v979_v18 = vmul.f32 %v1712_v47, %v550_v56  ;;  %v1809_v5 = vadd.f32 %v867_v37, %v853_v9  ;;  %v877_v15 = vrot.slane %v1747_v14, %v1618_v24  ;;  %v852_v27 = vadd.f32 %v850_v62, %v836_v59 }
 0x12c   : > { %v1795_v2 = vpop.permute.xlu0 %990  ;;  %v1797_v21 = vpop.permute.xlu1 %1022  ;;  %v733_v31 = vadd.f32 %v731_v16, %v717_v43  ;;  %v747_v60 = vmul.f32 %v742_v55, %v1714_v48  ;;  %v899_v4 = vmul.f32 %v1716_v49, %v1722_v54  ;;  %v866_v25 = vmul.f32 %v861_v52, %v1700_v40 }
 0x12d   : > { %v763_v56 = vmul.f32 %v758_v10, %v1688_v35  ;;  %v556_v57 = vmul.f32 %v1773_v6, %v1690_v36  ;;  %v570_v14 = vmul.f32 %v1783_v23, %v1647_v26  ;;  %v987_v40 = vadd.f32 %v985_v8, %v979_v18 }
 0x12e   : > { %v749_v59 = vadd.f32 %v747_v60, %v733_v31  ;;  %v909_v62 = vrot.slane %v899_v4, %v1610_v17  ;;  %v923_v55 = vrot.slane %v899_v4, %v1612_v19  ;;  %v939_v9 = vrot.slane %v899_v4, %v1616_v22 }
 0x12f   : > { %690 = vrot.lane.b32.xlu0 %v686_v7, %s1431_s22  ;;  %v993_v52 = vmul.f32 %v1795_v2, %v1730_v58  ;;  %v868_v37 = vadd.f32 %v866_v25, %v852_v27  ;;  %v600_v7 = vrot.slane %v1739_v63, %v1618_v24  ;;  %v955_v16 = vrot.slane %v899_v4, %v1618_v24 }
 0x130   : > { %v765_v43 = vadd.f32 %v763_v56, %v749_v59  ;;  %v914_v26 = vmul.f32 %v909_v62, %v1702_v3  ;;  %v928_v10 = vmul.f32 %v923_v55, %v1704_v41  ;;  %v572_v31 = vadd.f32 %v570_v14, %v556_v57 }
 0x131   : > { %v1823_v53 = vpop.permute.xlu0 %871  ;;  %v1825_v0 = vpop.permute.xlu1 %1036  ;;  %v586_v8 = vmul.f32 %v1804_v44, %v1653_v28  ;;  %v944_v27 = vmul.f32 %v939_v9, %v1708_v45  ;;  %v783_v60 = vmul.f32 %v1682_v32, %v1773_v6  ;;  %v995_v25 = vadd.f32 %v993_v52, %v987_v40 }
 0x132   : > { %v882_v36 = vmul.f32 %v877_v15, %v1823_v53  ;;  %v930_v15 = vadd.f32 %v928_v10, %v914_v26  ;;  %v789_v4 = vmul.f32 %v1684_v33, %v1783_v23  ;;  %v960_v55 = vmul.f32 %v955_v16, %v1720_v51 }
 0x133   : > { %769 = vrot.lane.b32.xlu0 %v765_v43, %s1432_s23  ;;  %v588_v57 = vadd.f32 %v586_v8, %v572_v31  ;;  %v602_v9 = vmul.f32 %v600_v7, %v1686_v34  ;;  %v624_v32 = vmul.f32 %v1675_v12, %v1739_v63  ;;  %v986_v33 = vmul.f32 %v1710_v46, %v1783_v23 }
 0x134   : > { %v884_v18 = vadd.f32 %v882_v36, %v868_v37  ;;  %v946_v28 = vadd.f32 %v944_v27, %v930_v15  ;;  %v791_v62 = vadd.f32 %v789_v4, %v783_v60  ;;  %v797_v52 = vmul.f32 %v1718_v50, %v1804_v44 }
 0x135   : > { %v999_v58 = vpop.permute.xlu0 %998  ;;  %v604_v34 = vadd.f32 %v602_v9, %v588_v57  ;;  %v637_v12 = vrot.slane %v624_v32, %v1610_v17  ;;  %v651_v26 = vrot.slane %v624_v32, %v1612_v19  ;;  %v994_v46 = vmul.f32 %v1795_v2, %v1804_v44 }
 0x136   : > { %v1001_v56 = vmul.f32 %v999_v58, %v1736_v61  ;;  %v1845_v59 = vpop.permute.xlu1 %1052  ;;  %v980_v61 = vmul.f32 %v1712_v47, %v1773_v6  ;;  %v962_v37 = vadd.f32 %v960_v55, %v946_v28  ;;  %v799_v43 = vadd.f32 %v797_v52, %v791_v62 }
 0x137   : > { %888 = vrot.lane.b32.xlu0 %v884_v18, %s1433_s8  ;;  %v703_v47 = vmul.f32 %v1698_v39, %v1739_v63  ;;  %v805_v16 = vmul.f32 %v1696_v1, %v600_v7  ;;  %v1002_v31 = vmul.f32 %v999_v58, %v600_v7  ;;  %v639_v18 = vmul.f32 %v637_v12, %v1694_v38 }
 0x138   : > { %v1003_v14 = vadd.f32 %v1001_v56, %v995_v25  ;;  %v988_v50 = vadd.f32 %v986_v33, %v980_v61  ;;  %v653_v15 = vmul.f32 %v651_v26, %v1658_v29  ;;  %v667_v1 = vrot.slane %v624_v32, %v1616_v22 }
 0x139   : > { %v807_v44 = vadd.f32 %v805_v16, %v799_v43  ;;  %v716_v27 = vrot.slane %v703_v47, %v1610_v17  ;;  %v1881_v4 = vpop.permute.xlu0 %1068  ;;  %v730_v7 = vrot.slane %v703_v47, %v1612_v19  ;;  %v900_v62 = vmul.f32 %v1716_v49, %v1739_v63 }
 0x13a   : > { %v1016_v40 = vpop.permute.xlu1 %1015  ;;  %1007 = vrot.lane.b32.xlu1 %v1003_v14, %s1434_s9  ;;  %v996_v60 = vadd.f32 %v994_v46, %v988_v50  ;;  %v655_v57 = vadd.f32 %v653_v15, %v639_v18  ;;  %v669_v9 = vmul.f32 %v667_v1, %v1663_v30  ;;  %v683_v61 = vrot.slane %v624_v32, %v1618_v24 }
 0x13b   : > { %v1018_v36 = vmul.f32 %v1016_v40, %v1722_v54  ;;  %966 = vrot.lane.b32.xlu0 %v962_v37, %s1435_s10  ;;  %v718_v29 = vmul.f32 %v716_v27, %v1670_v11  ;;  %v732_v14 = vmul.f32 %v730_v7, %v1706_v42  ;;  %v746_v33 = vrot.slane %v703_v47, %v1616_v22  ;;  %v1099_v11 = vld [vmem:[%s1971_s3] sm:$0xf] }
 0x13c   : > { %v1004_v58 = vadd.f32 %v1002_v31, %v996_v60  ;;  %v1019_v52 = vmul.f32 %v1016_v40, %v1739_v63  ;;  %v671_v42 = vadd.f32 %v669_v9, %v655_v57  ;;  %v927_v37 = vrot.slane %v900_v62, %v1612_v19 }
 0x13d   : > { %v1028_v6 = vrot.slane %v1018_v36, %v1610_v17  ;;  %v1042_v23 = vrot.slane %v1018_v36, %v1612_v19  ;;  %v1058_v10 = vrot.slane %v1018_v36, %v1616_v22  ;;  %v1074_v2 = vrot.slane %v1018_v36, %v1618_v24 }
 0x13e   : > { %609 = vrot.lane.b32.xlu1 %v604_v34, %s1429_s20  ;;  %v734_v49 = vadd.f32 %v732_v14, %v718_v29  ;;  %v913_v36 = vrot.slane %v900_v62, %v1610_v17  ;;  %v685_v30 = vmul.f32 %v683_v61, %v1679_v13  ;;  %v748_v32 = vmul.f32 %v746_v33, %v1714_v48  ;;  %v504_v60 = vpop.permute.xlu1 %503  ;;  %s329_s20 = scalar_lea.vmem %s1975_s7, %s1274_s16 }
 0x13f   : > { %v1033_v39 = vmul.f32 %v1028_v6, %v1797_v21  ;;  %v1047_v8 = vmul.f32 %v1042_v23, %v1825_v0  ;;  %v1063_v56 = vmul.f32 %v1058_v10, %v1845_v59  ;;  %v1079_v38 = vmul.f32 %v1074_v2, %v1881_v4 }
 0x140   : > { %v762_v63 = vrot.slane %v703_v47, %v1618_v24  ;;  %v1032_v40 = vrot.slane %v1019_v52, %v1610_v17  ;;  %v1046_v34 = vrot.slane %v1019_v52, %v1612_v19  ;;  %v687_v43 = vadd.f32 %v685_v30, %v671_v42 }
 0x141   : > { %v1049_v25 = vadd.f32 %v1047_v8, %v1033_v39  ;;  %v750_v12 = vadd.f32 %v748_v32, %v734_v49  ;;  %v915_v26 = vmul.f32 %v913_v36, %v1702_v3  ;;  %v929_v46 = vmul.f32 %v927_v37, %v1704_v41 }
 0x142   : > { %812 = vrot.lane.b32.xlu1 %v807_v44, %s1430_s21  ;;  %v881_v6 = vrot.slane %v1754_v20, %v1618_v24  ;;  %v764_v13 = vmul.f32 %v762_v63, %v1688_v35  ;;  %v943_v48 = vrot.slane %v900_v62, %v1616_v22  ;;  %v1984_v23 = vmov 2  }
 0x143   : > { %v1065_v28 = vadd.f32 %v1063_v56, %v1049_v25  ;;  %v1985_v50 = vmov 3   ;;  %v931_v16 = vadd.f32 %v929_v46, %v915_v26  ;;  %v1034_v3 = vmul.f32 %v1032_v40, %v1797_v21  ;;  %v523_v25 = vpop.permute.xlu1 %522  ;;  %v513_v56 = vpop.permute.xlu0 %512 }
 0x144   : > { %v883_v47 = vmul.f32 %v881_v6, %v1823_v53  ;;  %v766_v10 = vadd.f32 %v764_v13, %v750_v12  ;;  %v1048_v41 = vmul.f32 %v1046_v34, %v1825_v0  ;;  %v1062_v20 = vrot.slane %v1019_v52, %v1616_v22 }
 0x145   : > { %v1081_v55 = vadd.f32 %v1079_v38, %v1065_v28  ;;  %v945_v35 = vmul.f32 %v943_v48, %v1708_v45  ;;  %v959_v31 = vrot.slane %v900_v62, %v1618_v24  ;;  %v1437_v2 = vmov 4   ;;  %v1987_v28 = vld [vmem:[#allocation3_spill] sm:$0xff] }
 0x146   : > { %1009 = vrot.lane.b32.xlu1 %v1004_v58, %s1434_s9  ;;  %v885_v53 = vadd.f32 %v883_v47, %v1809_v5  ;;  %v1050_v8 = vadd.f32 %v1048_v41, %v1034_v3  ;;  %v1064_v0 = vmul.f32 %v1062_v20, %v1845_v59  ;;  %v1078_v44 = vrot.slane %v1019_v52, %v1618_v24  ;;  %v1986_v5 = vld [vmem:[#allocation2_spill] sm:$0xff] }
 0x147   : > { %1085 = vrot.lane.b32.xlu0 %v1081_v55, %s1436_s11  ;;  %v947_v39 = vadd.f32 %v945_v35, %v931_v16  ;;  %v961_v21 = vmul.f32 %v959_v31, %v1720_v51  ;;  %v1095_v1 = vpop.permute.xlu0 %1094  ;;  %v500_v38 = vmul.f32 %v1987_v28, %v1722_v54 }
 0x148   : > { %v1066_v15 = vadd.f32 %v1064_v0, %v1050_v8  ;;  %v1080_v45 = vmul.f32 %v1078_v44, %v1881_v4  ;;  %v533_v51 = vpop.permute.xlu1 %532 }
 0x149   : > { %v963_v18 = vadd.f32 %v961_v21, %v947_v39  ;;  %v509_v29 = vrot.slane %v500_v38, %v1610_v17  ;;  %v518_v14 = vrot.slane %v500_v38, %v1612_v19  ;;  %v528_v9 = vrot.slane %v500_v38, %v1616_v22 }
 0x14a   : > { %1111 = vperm.xlu1 %1374, %v1099_v11   ;;  %v1082_v27 = vadd.f32 %v1080_v45, %v1066_v15  ;;  %v538_v52 = vrot.slane %v500_v38, %v1618_v24 }
 0x14b   : > { %1102 = vperm.xlu0 %1373, %v1099_v11   ;;  %v510_v62 = vmul.f32 %v509_v29, %v504_v60  ;;  %v519_v55 = vmul.f32 %v518_v14, %v513_v56  ;;  %v529_v33 = vmul.f32 %v528_v9, %v523_v25 }
 0x14c   : > { %v539_v49 = vmul.f32 %v538_v52, %v533_v51 }
 0x14d   : > { %v520_v42 = vadd.f32 %v519_v55, %v510_v62 }
 0x14e   : > { %692 = vrot.lane.b32.xlu1 %v687_v43, %s1431_s22 }
 0x14f   : > { %1375 = vset.pattern.permute.xlu1 %v1984_v23  ;;  %1376 = vset.pattern.permute.xlu0 %v1985_v50  ;;  %v530_v54 = vadd.f32 %v529_v33, %v520_v42 }
 0x150   : > { %1131 = vperm.xlu0 %1376, %v1099_v11  }
 0x151   : > { %v540_v30 = vadd.f32 %v539_v49, %v530_v54 }
 0x152   : > { %771 = vrot.lane.b32.xlu1 %v766_v10, %s1432_s23 }
 0x154   : > { %1378 = vset.pattern.permute.xlu0 %v1437_v2 }
 0x156   : > { %890 = vrot.lane.b32.xlu1 %v885_v53, %s1433_s8 }
 0x15a   : > { %968 = vrot.lane.b32.xlu1 %v963_v18, %s1435_s10 }
 0x15e   : > { %1087 = vrot.lane.b32.xlu1 %v1082_v27, %s1436_s11 }
 0x162   : > { %1121 = vperm.xlu1 %1375, %v1099_v11  }
 0x166   : > { %1377 = vset.pattern.permute.xlu1 %v1437_v2 }
 0x167   : > { %1141 = vperm.xlu1 %1377, %v1986_v5  }
 0x199   : > { %v608_v58 = vpop.permute.xlu0 %607 }
 0x19d   : > { %v811_v4 = vpop.permute.xlu0 %810 }
 0x1a1   : > { %v691_v11 = vpop.permute.xlu0 %690 }
 0x1a5   : > { %v770_v32 = vpop.permute.xlu0 %769 }
 0x1a9   : > { %v889_v46 = vpop.permute.xlu0 %888 }
 0x1ac   : > { %v1008_v59 = vpop.permute.xlu1 %1007 }
 0x1ad   : > { %v967_v50 = vpop.permute.xlu0 %966 }
 0x1b0   : > { %v610_v7 = vpop.permute.xlu1 %609 }
 0x1b1   : > { %v612_v37 = vsel %vm611_vm2, %v608_v58, %v610_v7 }
 0x1b2   : > { %v614_v34 = vadd.f32 %v612_v37, %v540_v30 }
 0x1b4   : > { %v813_v57 = vpop.permute.xlu1 %812 }
 0x1b5   : > { %v815_v13 = vsel %vm814_vm5, %v811_v4, %v813_v57  ;;  %v1988_v57 = vld [vmem:[#allocation4_spill] sm:$0xff] }
 0x1b8   : > { %v1010_v61 = vpop.permute.xlu1 %1009 }
 0x1b9   : > { %v1012_v20 = vsel %vm1011_vm8, %v1008_v59, %v1010_v61  ;;  %v1086_v35 = vpop.permute.xlu0 %1085 }
 0x1c9   : > { %v1112_v36 = vpop.permute.xlu1 %1111 }
 0x1ca   : > { %v1103_v21 = vpop.permute.xlu0 %1102 }
 0x1cd   : > { %v693_v63 = vpop.permute.xlu1 %692 }
 0x1ce   : > { %v695_v40 = vsel %vm694_vm3, %v691_v11, %v693_v63 }
 0x1cf   : > { %v697_v43 = vadd.f32 %v695_v40, %v614_v34  ;;  %v1132_v25 = vpop.permute.xlu0 %1131 }
 0x1d1   : > { %v772_v12 = vpop.permute.xlu1 %771 }
 0x1d2   : > { %v774_v26 = vsel %vm773_vm4, %v770_v32, %v772_v12 }
 0x1d3   : > { %v776_v6 = vadd.f32 %v774_v26, %v697_v43 }
 0x1d5   : > { %v891_v48 = vpop.permute.xlu1 %890  ;;  %v817_v47 = vadd.f32 %v815_v13, %v776_v6 }
 0x1d6   : > { %v893_v23 = vsel %vm892_vm6, %v889_v46, %v891_v48 }
 0x1d7   : > { %v895_v10 = vadd.f32 %v893_v23, %v817_v47 }
 0x1d9   : > { %v969_v16 = vpop.permute.xlu1 %968 }
 0x1da   : > { %v971_v3 = vsel %vm970_vm7, %v967_v50, %v969_v16 }
 0x1db   : > { %v973_v41 = vadd.f32 %v971_v3, %v895_v10 }
 0x1dd   : > { %v1088_v31 = vpop.permute.xlu1 %1087  ;;  %v1014_v53 = vadd.f32 %v1012_v20, %v973_v41 }
 0x1de   : > { %v1090_v39 = vsel %vm1089_vm9, %v1086_v35, %v1088_v31 }
 0x1df   : > { %v1092_v8 = vadd.f32 %v1090_v39, %v1014_v53 }
 0x1e1   : > { %v1097_v2 = vadd.f32 %v1095_v1, %v1092_v8  ;;  %v1122_v45 = vpop.permute.xlu1 %1121 }
 0x1e3   : > { %v1098_v0 = vmax.f32 %v1097_v2, 0.0 }
 0x1e5   : > { %v1108_v44 = vrot.slane %v1098_v0, %v1610_v17  ;;  %v1117_v18 = vrot.slane %v1098_v0, %v1612_v19  ;;  %v1127_v15 = vrot.slane %v1098_v0, %v1616_v22  ;;  %v1137_v60 = vrot.slane %v1098_v0, %v1618_v24 }
 0x1e6   : > { %v1142_v7 = vpop.permute.xlu1 %1141 }
 0x1e7   : > { %v1118_v27 = vmul.f32 %v1117_v18, %v1112_v36  ;;  %v1109_v5 = vmul.f32 %v1108_v44, %v1103_v21  ;;  %v1128_v56 = vmul.f32 %v1127_v15, %v1122_v45  ;;  %v1138_v1 = vmul.f32 %v1137_v60, %v1132_v25 }
 0x1e9   : > { %v1119_v51 = vadd.f32 %v1118_v27, %v1109_v5 }
 0x1eb   : > { %v1129_v59 = vadd.f32 %v1128_v56, %v1119_v51 }
 0x1ed   : > { %v1139_v58 = vadd.f32 %v1138_v1, %v1129_v59 }
 0x1ef   : > { %v1144_v28 = vadd.f32 %v1142_v7, %v1139_v58 }
 0x1f1   : > { %v1145_v17 = vmax.f32 %v1144_v28, 0.0 }
 0x1f3   : > { %1147 = vrot.lane.b32.xlu1 %v1145_v17, %s1423_s18 }
 0x265   : > { %v1148_v19 = vpop.permute.xlu1 %1147 }
 0x266   : > { %v1149_v22 = vrot.slane %v1148_v19, 4 }
 0x268   : > { %v1151_v38 = vsel %vm1150_vm10, %v1149_v22, %v1148_v19 }
 0x269   : > { %v1153_v4 = vadd.f32 %v1151_v38, %v1988_v57 }
 0x26b   : > { %1156 = vrot.lane.b32.xlu0 %v1153_v4, %s1432_s23  ;;  %v1155_v24 = vcombine.high %v1153_v4, %v1153_v4 }
 0x26d   : > { %1158 = vrot.lane.b32.xlu1 %v1155_v24, %s1432_s23 }
 0x2dd   : > { %v1157_v29 = vpop.permute.xlu0 %1156 }
 0x2df   : > { %v1159_v14 = vpop.permute.xlu1 %1158 }
 0x2e0   : > { %v1160_v62 = vsel %vm773_vm4, %v1157_v29, %v1159_v14 }
 0x2e1   : > { %1162 = vst [vmem:[%s329_s20] sm:$0xf] %v1160_v62 }
 0x2e2 PF: > { %s17_s28 = sadd.s32 1, %s1417_s28   ;;  %s1989_s24 = smov %s1409_s26 }
 0x2e3   : > { %p14_p7 = scmp.ge.s32.totalorder %s17_s28, 6   ;;  %s1990_s25 = smov %s1413_s27 }
 0x2e4   : > { %s1991_s26 = smov %s1994_s29  ;;  %s1992_s27 = smov %s1998_s30 }
 0x2e5   :  { %16 = sbr.rel (!%p14_p7) target bundleno = 3 (0x3), region = 81 }

</bundles_post_ra>
